<compile_context>
chip_gen: v7x
topology: tpu7x:2x2x1
jax: 0.10.0
libtpu: 0.0.40
codegen_flags: <defaults>
</compile_context>

<pallas_src>
import functools

import jax
import jax.numpy as jnp
import numpy as np
from jax.experimental import pallas as pl
from jax.experimental.pallas import tpu as pltpu


def _round_up(x, m):
    return (x + m - 1) // m * m


def _aspp_conv_kernel(x_ref, w_ref, bias_ref, o_ref, acc_ref, *,
                      dilation, out_h, out_w):
    # x_ref:    (1, H+2d, W8+2d, TCin)  bf16 padded activations (one Cin tile)
    # w_ref:    (3, 3*TCin, TCout)      bf16 taps, kh folded into K, BN scale folded
    # bias_ref: (1, TCout)              f32 folded BN bias
    # o_ref:    (1, H, W8, TCout)       bf16 output block (written on last Cin step)
    # acc_ref:  (H*W8, TCout)           f32 accumulator, resident across the Cin axis
    ci = pl.program_id(2)
    d = dilation
    H, W8 = out_h, out_w
    tci = x_ref.shape[-1]

    # 3x3 dilated conv as 3 long-K matmuls: for each kw tap, the three kh taps
    # are concatenated along the lane/K axis (weights pre-interleaved to match),
    # and the three kw results are summed as values -> one acc update per step.
    y = None
    for kw in range(3):
        taps = [x_ref[0, kh * d:kh * d + H, kw * d:kw * d + W8, :]
                for kh in range(3)]
        xcat = jnp.concatenate(taps, axis=-1).reshape(H * W8, 3 * tci)
        p = jnp.dot(xcat, w_ref[kw], preferred_element_type=jnp.float32)
        y = p if y is None else y + p

    @pl.when(ci == 0)
    def _init():
        acc_ref[...] = y

    @pl.when(ci > 0)
    def _accumulate():
        acc_ref[...] = acc_ref[...] + y

    @pl.when(ci == pl.num_programs(2) - 1)
    def _finalize():
        out = jnp.maximum(acc_ref[...] + bias_ref[...], 0.0)   # folded BN bias + ReLU
        o_ref[0] = out.reshape(H, W8, -1).astype(o_ref.dtype)


def aspp_conv(x_nchw, weight, gamma, beta, running_mean, running_var,
              *, dilation, eps=1e-5):
    """ASPPConv forward. x_nchw: (N, Cin, H, W). weight: (Cout, Cin, 3, 3)."""
    N, Cin, H, W = x_nchw.shape
    Cout = weight.shape[0]
    d = int(dilation)

    # --- Tiling: pad channels to lane multiples; Cin tile fixed at 128 (VMEM
    # safety on v7x); Cout tile 256 only if >= 2 parallel grid units remain.
    Cin_p = _round_up(Cin, 128)
    Cout_p = _round_up(Cout, 128)
    tci = 128
    tco = 256 if (Cout_p % 256 == 0 and N * (Cout_p // 256) >= 2) else 128
    n_ci = Cin_p // tci
    n_co = Cout_p // tco

    # Output width padded to a sublane multiple so flattening (H,W8,C)->(H*W8,C) is free.
    W8 = _round_up(W, 8)
    Hp = H + 2 * d
    Wp8 = W8 + 2 * d

    # --- Fold BatchNorm (eval, running stats): scale into weights, bias as f32 epilogue.
    scale = (gamma / jnp.sqrt(running_var + eps)).astype(jnp.float32)       # (Cout,)
    bias = (beta - running_mean * scale).astype(jnp.float32)                # (Cout,)
    bias_p = jnp.pad(bias, (0, Cout_p - Cout)).reshape(1, Cout_p)

    # Weights: (Cout, Cin, kh, kw) -> (kw, kh, Cin, Cout) * scale
    #          -> (kw, n_ci, kh, tci, Cout_p) -> (3, 3*Cin_p, Cout_p)  (kh folded into K)
    wt = jnp.transpose(weight.astype(jnp.float32), (3, 2, 1, 0)) * scale
    wt = jnp.pad(wt, ((0, 0), (0, 0), (0, Cin_p - Cin), (0, Cout_p - Cout)))
    wt = wt.reshape(3, 3, n_ci, tci, Cout_p)
    wt = jnp.transpose(wt, (0, 2, 1, 3, 4)).reshape(3, 3 * Cin_p, Cout_p)
    wt = wt.astype(jnp.bfloat16)

    # Activations: channel-blocked NHWC (contiguous per-tile DMA), bf16, halo pad.
    xp = jnp.pad(x_nchw, ((0, 0), (0, Cin_p - Cin), (0, 0), (0, 0)))
    xp = xp.reshape(N, n_ci, tci, H, W)
    xp = jnp.transpose(xp, (0, 1, 3, 4, 2)).astype(jnp.bfloat16)            # (N,n_ci,H,W,tci)
    xp = jnp.pad(xp, ((0, 0), (0, 0), (d, d), (d, d + W8 - W), (0, 0)))
    xp = xp.reshape(N * n_ci, Hp, Wp8, tci)
    # TODO(synk): fuse these layout ops with the producer / keep NHWC end-to-end.

    # --- VMEM budget from actual block sizes (double-buffered in/out + resident acc).
    x_blk = Hp * Wp8 * tci * 2
    w_blk = 3 * 3 * tci * tco * 2
    o_blk = H * W8 * tco * 2
    acc_blk = H * W8 * tco * 4
    need = 2 * (x_blk + w_blk + o_blk + tco * 4) + acc_blk
    vmem_limit = max(32 << 20, min(int(need * 1.25) + (4 << 20), 100 << 20))

    kernel = functools.partial(_aspp_conv_kernel, dilation=d, out_h=H, out_w=W8)

    out_nhwc = pl.pallas_call(
        kernel,
        out_shape=jax.ShapeDtypeStruct((N, H, W8, Cout_p), jnp.bfloat16),
        grid_spec=pltpu.PrefetchScalarGridSpec(
            num_scalar_prefetch=0,
            grid=(N, n_co, n_ci),
            in_specs=[
                pl.BlockSpec((1, Hp, Wp8, tci),
                             lambda n, co, ci: (n * n_ci + ci, 0, 0, 0)),
                pl.BlockSpec((3, 3 * tci, tco), lambda n, co, ci: (0, ci, co)),
                pl.BlockSpec((1, tco), lambda n, co, ci: (0, co)),
            ],
            out_specs=pl.BlockSpec((1, H, W8, tco),
                                   lambda n, co, ci: (n, 0, 0, co)),
            scratch_shapes=[pltpu.VMEM((H * W8, tco), jnp.float32)],
        ),
        compiler_params=pltpu.CompilerParams(
            dimension_semantics=("parallel", "parallel", "arbitrary"),
            vmem_limit_bytes=vmem_limit,
        ),
    )(xp, wt, bias_p)

    # Strip channel/width padding, NHWC -> NCHW, cast back to input dtype.
    out = out_nhwc[:, :, :W, :Cout]
    return jnp.transpose(out, (0, 3, 1, 2)).astype(x_nchw.dtype)


def _reference(x_nchw, weight, gamma, beta, running_mean, running_var,
               *, dilation, eps=1e-5):
    y = jax.lax.conv_general_dilated(
        x_nchw, weight,
        window_strides=(1, 1),
        padding=[(dilation, dilation), (dilation, dilation)],
        rhs_dilation=(dilation, dilation),
        dimension_numbers=("NCHW", "OIHW", "NCHW"),
        precision=jax.lax.Precision.HIGHEST,
    )
    scale = gamma / jnp.sqrt(running_var + eps)
    bias = beta - running_mean * scale
    y = y * scale[None, :, None, None] + bias[None, :, None, None]
    return jnp.maximum(y, 0.0)


if __name__ == "__main__":
    key = jax.random.PRNGKey(0)
    N, Cin, H, W = 2, 4, 16, 16
    Cout = 8
    dilation = 2

    kx, kw_, kg, kb, km, kv = jax.random.split(key, 6)
    x = jax.random.normal(kx, (N, Cin, H, W), dtype=jnp.float32)
    weight = jax.random.normal(kw_, (Cout, Cin, 3, 3), dtype=jnp.float32) * 0.1
    gamma = 1.0 + 0.1 * jax.random.normal(kg, (Cout,), dtype=jnp.float32)
    beta = 0.1 * jax.random.normal(kb, (Cout,), dtype=jnp.float32)
    running_mean = 0.05 * jax.random.normal(km, (Cout,), dtype=jnp.float32)
    running_var = 1.0 + 0.1 * jax.random.uniform(kv, (Cout,), dtype=jnp.float32)

    out = aspp_conv(x, weight, gamma, beta, running_mean, running_var,
                    dilation=dilation)
    out = jax.block_until_ready(out)

    ref = _reference(x, weight, gamma, beta, running_mean, running_var,
                     dilation=dilation)
    # bf16 MXU inputs + bf16 output (f32 accumulation) vs pure-f32 reference:
    # ~1e-2-level deviation is expected; tolerance loosened accordingly.
    np.testing.assert_allclose(np.asarray(out), np.asarray(ref),
                               rtol=3e-2, atol=3e-2)
    print("KERNEL_OK")
</pallas_src>

<mosaic_0001>
module attributes {stable_mosaic.version = 11 : i64} {
  func.func @_aspp_conv_kernel(%arg0: i32, %arg1: i32, %arg2: i32, %arg3: memref<1x20x20x128xbf16, #tpu.memory_space<vmem>>, %arg4: memref<3x384x128xbf16, #tpu.memory_space<vmem>>, %arg5: memref<1x128xf32, #tpu.memory_space<vmem>>, %arg6: memref<1x16x16x128xbf16, #tpu.memory_space<vmem>>, %arg7: memref<256x128xf32, #tpu.memory_space<vmem>>) attributes {dimension_semantics = [#tpu.dimension_semantics<parallel>, #tpu.dimension_semantics<parallel>, #tpu.dimension_semantics<arbitrary>], iteration_bounds = array<i64: 2, 1, 1>, scalar_prefetch = 0 : i64, scratch_operands = 1 : i64, tpu.core_type = #tpu.core_type<tc>, window_params = [{transform_indices = @transform_0, window_bounds = array<i64: 1, 20, 20, 128>}, {transform_indices = @transform_1, window_bounds = array<i64: 3, 384, 128>}, {transform_indices = @transform_2, window_bounds = array<i64: 1, 128>}, {transform_indices = @transform_3, window_bounds = array<i64: 1, 16, 16, 128>}]} {
    %c0 = arith.constant 0 : index
    %c0_0 = arith.constant 0 : index
    %c0_1 = arith.constant 0 : index
    %c0_2 = arith.constant 0 : index
    %0 = vector.load %arg3[%c0, %c0_0, %c0_1, %c0_2] : memref<1x20x20x128xbf16, #tpu.memory_space<vmem>>, vector<1x16x16x128xbf16>
    %1 = vector.shape_cast %0 : vector<1x16x16x128xbf16> to vector<16x16x128xbf16>
    %c0_3 = arith.constant 0 : index
    %c2 = arith.constant 2 : index
    %c0_4 = arith.constant 0 : index
    %c0_5 = arith.constant 0 : index
    %2 = vector.load %arg3[%c0_3, %c2, %c0_4, %c0_5] : memref<1x20x20x128xbf16, #tpu.memory_space<vmem>>, vector<1x16x16x128xbf16>
    %3 = vector.shape_cast %2 : vector<1x16x16x128xbf16> to vector<16x16x128xbf16>
    %c0_6 = arith.constant 0 : index
    %c4 = arith.constant 4 : index
    %c0_7 = arith.constant 0 : index
    %c0_8 = arith.constant 0 : index
    %4 = vector.load %arg3[%c0_6, %c4, %c0_7, %c0_8] : memref<1x20x20x128xbf16, #tpu.memory_space<vmem>>, vector<1x16x16x128xbf16>
    %5 = vector.shape_cast %4 : vector<1x16x16x128xbf16> to vector<16x16x128xbf16>
    %6 = tpu.concatenate %1, %3, %5 in 2 : vector<16x16x128xbf16>, vector<16x16x128xbf16>, vector<16x16x128xbf16> -> vector<16x16x384xbf16>
    %7 = vector.shape_cast %6 : vector<16x16x384xbf16> to vector<256x384xbf16>
    %c0_9 = arith.constant 0 : index
    %c0_10 = arith.constant 0 : index
    %c0_11 = arith.constant 0 : index
    %8 = vector.load %arg4[%c0_9, %c0_10, %c0_11] : memref<3x384x128xbf16, #tpu.memory_space<vmem>>, vector<1x384x128xbf16>
    %9 = vector.shape_cast %8 : vector<1x384x128xbf16> to vector<384x128xbf16>
    %cst = arith.constant dense<0.000000e+00> : vector<256x128xf32>
    %10 = tpu.matmul %7, %9, %cst {dimension_numbers = #tpu.dot_dimension_numbers<[1], [0], [0], [1], [0, 0, 1, 1], [], []>} : vector<256x384xbf16>, vector<384x128xbf16>, vector<256x128xf32> -> vector<256x128xf32>
    %c0_12 = arith.constant 0 : index
    %c0_13 = arith.constant 0 : index
    %c2_14 = arith.constant 2 : index
    %c0_15 = arith.constant 0 : index
    %11 = vector.load %arg3[%c0_12, %c0_13, %c2_14, %c0_15] : memref<1x20x20x128xbf16, #tpu.memory_space<vmem>>, vector<1x16x16x128xbf16>
    %12 = vector.shape_cast %11 : vector<1x16x16x128xbf16> to vector<16x16x128xbf16>
    %c0_16 = arith.constant 0 : index
    %c2_17 = arith.constant 2 : index
    %c2_18 = arith.constant 2 : index
    %c0_19 = arith.constant 0 : index
    %13 = vector.load %arg3[%c0_16, %c2_17, %c2_18, %c0_19] : memref<1x20x20x128xbf16, #tpu.memory_space<vmem>>, vector<1x16x16x128xbf16>
    %14 = vector.shape_cast %13 : vector<1x16x16x128xbf16> to vector<16x16x128xbf16>
    %c0_20 = arith.constant 0 : index
    %c4_21 = arith.constant 4 : index
    %c2_22 = arith.constant 2 : index
    %c0_23 = arith.constant 0 : index
    %15 = vector.load %arg3[%c0_20, %c4_21, %c2_22, %c0_23] : memref<1x20x20x128xbf16, #tpu.memory_space<vmem>>, vector<1x16x16x128xbf16>
    %16 = vector.shape_cast %15 : vector<1x16x16x128xbf16> to vector<16x16x128xbf16>
    %17 = tpu.concatenate %12, %14, %16 in 2 : vector<16x16x128xbf16>, vector<16x16x128xbf16>, vector<16x16x128xbf16> -> vector<16x16x384xbf16>
    %18 = vector.shape_cast %17 : vector<16x16x384xbf16> to vector<256x384xbf16>
    %c1 = arith.constant 1 : index
    %c0_24 = arith.constant 0 : index
    %c0_25 = arith.constant 0 : index
    %19 = vector.load %arg4[%c1, %c0_24, %c0_25] : memref<3x384x128xbf16, #tpu.memory_space<vmem>>, vector<1x384x128xbf16>
    %20 = vector.shape_cast %19 : vector<1x384x128xbf16> to vector<384x128xbf16>
    %cst_26 = arith.constant dense<0.000000e+00> : vector<256x128xf32>
    %21 = tpu.matmul %18, %20, %cst_26 {dimension_numbers = #tpu.dot_dimension_numbers<[1], [0], [0], [1], [0, 0, 1, 1], [], []>} : vector<256x384xbf16>, vector<384x128xbf16>, vector<256x128xf32> -> vector<256x128xf32>
    %22 = arith.addf %10, %21 : vector<256x128xf32>
    %c0_27 = arith.constant 0 : index
    %c0_28 = arith.constant 0 : index
    %c4_29 = arith.constant 4 : index
    %c0_30 = arith.constant 0 : index
    %23 = vector.load %arg3[%c0_27, %c0_28, %c4_29, %c0_30] : memref<1x20x20x128xbf16, #tpu.memory_space<vmem>>, vector<1x16x16x128xbf16>
    %24 = vector.shape_cast %23 : vector<1x16x16x128xbf16> to vector<16x16x128xbf16>
    %c0_31 = arith.constant 0 : index
    %c2_32 = arith.constant 2 : index
    %c4_33 = arith.constant 4 : index
    %c0_34 = arith.constant 0 : index
    %25 = vector.load %arg3[%c0_31, %c2_32, %c4_33, %c0_34] : memref<1x20x20x128xbf16, #tpu.memory_space<vmem>>, vector<1x16x16x128xbf16>
    %26 = vector.shape_cast %25 : vector<1x16x16x128xbf16> to vector<16x16x128xbf16>
    %c0_35 = arith.constant 0 : index
    %c4_36 = arith.constant 4 : index
    %c4_37 = arith.constant 4 : index
    %c0_38 = arith.constant 0 : index
    %27 = vector.load %arg3[%c0_35, %c4_36, %c4_37, %c0_38] : memref<1x20x20x128xbf16, #tpu.memory_space<vmem>>, vector<1x16x16x128xbf16>
    %28 = vector.shape_cast %27 : vector<1x16x16x128xbf16> to vector<16x16x128xbf16>
    %29 = tpu.concatenate %24, %26, %28 in 2 : vector<16x16x128xbf16>, vector<16x16x128xbf16>, vector<16x16x128xbf16> -> vector<16x16x384xbf16>
    %30 = vector.shape_cast %29 : vector<16x16x384xbf16> to vector<256x384xbf16>
    %c2_39 = arith.constant 2 : index
    %c0_40 = arith.constant 0 : index
    %c0_41 = arith.constant 0 : index
    %31 = vector.load %arg4[%c2_39, %c0_40, %c0_41] : memref<3x384x128xbf16, #tpu.memory_space<vmem>>, vector<1x384x128xbf16>
    %32 = vector.shape_cast %31 : vector<1x384x128xbf16> to vector<384x128xbf16>
    %cst_42 = arith.constant dense<0.000000e+00> : vector<256x128xf32>
    %33 = tpu.matmul %30, %32, %cst_42 {dimension_numbers = #tpu.dot_dimension_numbers<[1], [0], [0], [1], [0, 0, 1, 1], [], []>} : vector<256x384xbf16>, vector<384x128xbf16>, vector<256x128xf32> -> vector<256x128xf32>
    %34 = arith.addf %22, %33 : vector<256x128xf32>
    %c0_i32 = arith.constant 0 : i32
    %35 = arith.cmpi eq, %arg2, %c0_i32 : i32
    %36 = arith.extui %35 : i1 to i32
    %c0_i32_43 = arith.constant 0 : i32
    %37 = arith.cmpi ne, %36, %c0_i32_43 : i32
    scf.if %37 {
      %c0_48 = arith.constant 0 : index
      %c0_49 = arith.constant 0 : index
      %44 = vector.load %arg7[%c0_48, %c0_49] : memref<256x128xf32, #tpu.memory_space<vmem>>, vector<256x128xf32>
      tpu.vector_store %arg7[%c0_48, %c0_49], %34 {strides = array<i32>} : memref<256x128xf32, #tpu.memory_space<vmem>>, vector<256x128xf32>,
    } else {
    }
    %c0_i32_44 = arith.constant 0 : i32
    %38 = arith.cmpi sgt, %arg2, %c0_i32_44 : i32
    %39 = arith.extui %38 : i1 to i32
    %c0_i32_45 = arith.constant 0 : i32
    %40 = arith.cmpi ne, %39, %c0_i32_45 : i32
    scf.if %40 {
      %c0_48 = arith.constant 0 : index
      %c0_49 = arith.constant 0 : index
      %44 = vector.load %arg7[%c0_48, %c0_49] : memref<256x128xf32, #tpu.memory_space<vmem>>, vector<256x128xf32>
      %45 = arith.addf %44, %34 : vector<256x128xf32>
      %c0_50 = arith.constant 0 : index
      %c0_51 = arith.constant 0 : index
      %46 = vector.load %arg7[%c0_50, %c0_51] : memref<256x128xf32, #tpu.memory_space<vmem>>, vector<256x128xf32>
      tpu.vector_store %arg7[%c0_50, %c0_51], %45 {strides = array<i32>} : memref<256x128xf32, #tpu.memory_space<vmem>>, vector<256x128xf32>,
    } else {
    }
    %c0_i32_46 = arith.constant 0 : i32
    %41 = arith.cmpi eq, %arg2, %c0_i32_46 : i32
    %42 = arith.extui %41 : i1 to i32
    %c0_i32_47 = arith.constant 0 : i32
    %43 = arith.cmpi ne, %42, %c0_i32_47 : i32
    scf.if %43 {
      %c0_48 = arith.constant 0 : index
      %c0_49 = arith.constant 0 : index
      %44 = vector.load %arg7[%c0_48, %c0_49] : memref<256x128xf32, #tpu.memory_space<vmem>>, vector<256x128xf32>
      %c0_50 = arith.constant 0 : index
      %c0_51 = arith.constant 0 : index
      %45 = vector.load %arg5[%c0_50, %c0_51] : memref<1x128xf32, #tpu.memory_space<vmem>>, vector<1x128xf32>
      %46 = vector.broadcast %45 : vector<1x128xf32> to vector<256x128xf32>
      %47 = arith.addf %44, %46 : vector<256x128xf32>
      %cst_52 = arith.constant 0.000000e+00 : f32
      %48 = vector.broadcast %cst_52 : f32 to vector<256x128xf32>
      %49 = arith.maximumf %47, %48 : vector<256x128xf32>
      %50 = vector.shape_cast %49 : vector<256x128xf32> to vector<16x16x128xf32>
      %51 = arith.truncf %50 : vector<16x16x128xf32> to vector<16x16x128xbf16>
      %c0_53 = arith.constant 0 : index
      %c0_54 = arith.constant 0 : index
      %c0_55 = arith.constant 0 : index
      %c0_56 = arith.constant 0 : index
      %52 = vector.load %arg6[%c0_53, %c0_54, %c0_55, %c0_56] : memref<1x16x16x128xbf16, #tpu.memory_space<vmem>>, vector<1x16x16x128xbf16>
      %53 = vector.shape_cast %52 : vector<1x16x16x128xbf16> to vector<16x16x128xbf16>
      %54 = vector.shape_cast %51 : vector<16x16x128xbf16> to vector<1x16x16x128xbf16>
      tpu.vector_store %arg6[%c0_53, %c0_54, %c0_55, %c0_56], %54 {strides = array<i32>} : memref<1x16x16x128xbf16, #tpu.memory_space<vmem>>, vector<1x16x16x128xbf16>,
    } else {
    }
    return
  }
  func.func @transform_0(%arg0: i32, %arg1: i32, %arg2: i32) -> (i32, i32, i32, i32) {
    %c1_i32 = arith.constant 1 : i32
    %0 = arith.muli %arg0, %c1_i32 : i32
    %1 = arith.addi %0, %arg2 : i32
    %c0_i32 = arith.constant 0 : i32
    %c0_i32_0 = arith.constant 0 : i32
    %c0_i32_1 = arith.constant 0 : i32
    %c0_i32_2 = arith.constant 0 : i32
    return %1, %c0_i32, %c0_i32_0, %c0_i32_1 : i32, i32, i32, i32
  }
  func.func @transform_1(%arg0: i32, %arg1: i32, %arg2: i32) -> (i32, i32, i32) {
    %c0_i32 = arith.constant 0 : i32
    %c0_i32_0 = arith.constant 0 : i32
    return %c0_i32, %arg2, %arg1 : i32, i32, i32
  }
  func.func @transform_2(%arg0: i32, %arg1: i32, %arg2: i32) -> (i32, i32) {
    %c0_i32 = arith.constant 0 : i32
    %c0_i32_0 = arith.constant 0 : i32
    return %c0_i32, %arg1 : i32, i32
  }
  func.func @transform_3(%arg0: i32, %arg1: i32, %arg2: i32) -> (i32, i32, i32, i32) {
    %c0_i32 = arith.constant 0 : i32
    %c0_i32_0 = arith.constant 0 : i32
    %c0_i32_1 = arith.constant 0 : i32
    return %arg0, %c0_i32, %c0_i32_0, %arg1 : i32, i32, i32, i32
  }
}

</mosaic_0001>

<bundles_post_ra>
// kernel: tpu_custom_call.1
= control target key start
LH: loop header
LB: loop body
LE: loop exit
PB: predicated region body
PF: predicated region fallthrough
CT: control target
= control target key end

     0   :  { %8 = vsyncpa [#allocation4], 0  ;;  %s7235_s0 = inlined_call_operand.vmem [shape: bf16[2,20,20,128], index: 0, kind: input, shape index: {}]   ;;  %s7236_s1 = inlined_call_operand.vmem [shape: bf16[3,384,128], index: 1, kind: input, shape index: {}]   ;;  %s7237_s2 = inlined_call_operand.vmem [shape: f32[1,128], index: 2, kind: input, shape index: {}]   ;;  %s7238_s3 = inlined_call_operand.hbm [shape: bf16[2,16,16,128], index: 3, kind: output, shape index: {}]  }
   0x1   :  { %10 = vsyncpa [#allocation4 + $0x1], 0  ;;  %s5899_s12 = smov 0   ;;  %s5901_s13 = smov 0  }
   0x2   :  { %s5903_s14 = smov 0   ;;  %s5905_s15 = smov 0  }
   0x3   :  { %s5907_s16 = smov 0   ;;  %s5909_s17 = smov 0  }
   0x4 LB: > { %s3883_s18 = sadd.s32 4294967295, %s5874_s17   ;;  %s3884_s19 = sadd.s32 4294967294, %s5874_s17   ;;  %s5874_s17 = sphi %s5909_s17, %s16_s17   ;;  %s5870_s16 = sphi %s5907_s16, %s7247_s16   ;;  %s5866_s15 = sphi %s5905_s15, %s7246_s15   ;;  %s5862_s14 = sphi %s5903_s14, %s7245_s14   ;;  %s5858_s13 = sphi %s5901_s13, %s7244_s13   ;;  %s5854_s12 = sphi %s5899_s12, %s7243_s12  }
   0x5   : > { %s35_s20 = sadd.s32 1, %s5870_s16  ;;  %s126_s21 = sadd.s32 1, %s5862_s14 }
   0x6   : > { %p37_p0 = scmp.ge.s32.totalorder %s35_s20, 2  ;;  %p136_p1 = scmp.ne.s32.totalorder %s5862_s14, %s5858_s13 }
   0x7   : > { %p137_p2 = scmp.eq.s32.totalorder %s3883_s18, 1  ;;  %p142_p3 = scmp.ne.s32.totalorder %s5858_s13, %s5854_s12 }
   0x8   : > { %s7249_s20 = smov (%p37_p0, %s35_s20), 0  ;;  %p143_p5 = scmp.eq.s32.totalorder %s3884_s19, 1 }
   0x9   : > { %p5939_p4 = por %p137_p2, %p136_p1  ;;  %s121_s23 = ssub.s32 %s5870_s16, %s7249_s20 }
   0xa   : > { %p3889_p6 = scmp.ge.s32.totalorder %s5874_s17, 1  ;;  %p124_p7 = scmp.eq.s32.totalorder %s121_s23, 0 }
   0xb   : > { %p5946_p8 = por %p143_p5, %p142_p3  ;;  %p189_p9 = scmp.lt.s32.totalorder %s5874_s17, 3 }
   0xc   : > { %s5952_s25 = scalar_select %p124_p7, %s5862_s14, %s126_s21  }
   0xd   : > { %p190_p10 = pnand %p3889_p6, %p189_p9 }
   0xf   : > { %193 = sbr.rel (%p190_p10) target bundleno = 581 (0x245), region = 32 }
  0x16   : > { %v5444_v0 = vld [vmem:[%s7236_s1 + $0x100] sm:$0xff]   ;;  %v5447_v3 = vld [vmem:[%s7236_s1 + $0x108] sm:$0xff]   ;;  %v5450_v6 = vld [vmem:[%s7236_s1 + $0x110] sm:$0xff]   ;;  %p226_p11 = scmp.lt.s32.totalorder %s5866_s15, 1  ;;  %vm1063_vm0 = vcmask 1046528   ;;  %vm2621_vm1 = vcmask 1045504  }
  0x17   : > { %v5960_v1 = vld [vmem:[%s7236_s1 + $0x140] sm:$0xff]   ;;  %4658 = vmatprep.subr.bf16.mxu0 %v5444_v0  ;;  %v5973_v4 = vld [vmem:[%s7236_s1 + $0x148] sm:$0xff]   ;;  %v5985_v7 = vld [vmem:[%s7236_s1 + $0x150] sm:$0xff]   ;;  %s222_s29 = sand.u32 1, %s5858_s13   ;;  %s4562_s5 = sshll.u32 %s5866_s15, 11 }
  0x18   : > { %v5446_v2 = vld [vmem:[%s7236_s1 + $0xc0] sm:$0xff]   ;;  %5210 = vmatprep.subr.bf16.mxu1 %v5960_v1  ;;  %v5449_v5 = vld [vmem:[%s7236_s1 + $0xc8] sm:$0xff]   ;;  %v5452_v8 = vld [vmem:[%s7236_s1 + $0xd0] sm:$0xff]   ;;  %s227_s10 = scalar_select %p226_p11, %s5866_s15, 1 }
  0x19   : > { %4659 = vmatpush3.bf16.msra.mxu0 %v5446_v2  ;;  %5218 = vmatpush3.bf16.msra.mxu1 %v5960_v1  ;;  %v5453_v9 = vld [vmem:[%s7236_s1 + $0x118] sm:$0xff]   ;;  %v5456_v12 = vld [vmem:[%s7236_s1 + $0x120] sm:$0xff]   ;;  %v5459_v15 = vld [vmem:[%s7236_s1 + $0x128] sm:$0xff]   ;;  %s3890_s30 = sshll.u32 %s222_s29, 7  ;;  %s7189_s11 = scalar_lea.sflag [#allocation4], %s222_s29 }
  0x1a   : > { %4660 = vmatprep.subr.bf16.mxu0 %v5447_v3  ;;  %5211 = vmatprep.subr.bf16.mxu1 %v5973_v4  ;;  %v5999_v10 = vld [vmem:[%s7236_s1 + $0x158] sm:$0xff]   ;;  %v6012_v13 = vld [vmem:[%s7236_s1 + $0x160] sm:$0xff]   ;;  %v6026_v16 = vld [vmem:[%s7236_s1 + $0x168] sm:$0xff]   ;;  %s5386_s27 = smul.u32 240, %s227_s10  ;;  %s7094_s4 = scalar_lea.vmem [#allocation3], %s3890_s30 }
  0x1b   : > { %v5455_v11 = vld [vmem:[%s7236_s1 + $0xd8] sm:$0xff]   ;;  %v5458_v14 = vld [vmem:[%s7236_s1 + $0xe0] sm:$0xff]   ;;  %v5461_v17 = vld [vmem:[%s7236_s1 + $0xe8] sm:$0xff]   ;;  %s3778_s6 = sshll.u32 %s7094_s4, 4  ;;  %s7182_s10 = scalar_lea.hbm %s7238_s3, %s4562_s5  ;;  %s7184_s6 = int_to_ptr.vmem [resolvable:$true] %s3778_s6 }
  0x1c   : > { %v5462_v18 = vld [vmem:[%s7236_s1 + $0x130] sm:$0xff]   ;;  %s6044_s9 = scalar_lea.vmem %s7235_s0, %s5386_s27  ;;  %v5465_v21 = vld [vmem:[%s7236_s1 + $0x138] sm:$0xff]   ;;  %v5477_v40 = vld [vmem:[%s7236_s1 + $0x40] sm:$0xff]   ;;  %s5796_s15 = scalar_lea.vmem %s7184_s6, 2048 }
  0x1d   : > { %4661 = vmatpush3.bf16.msra.mxu0 %v5449_v5  ;;  %5219 = vmatpush3.bf16.msra.mxu1 %v5973_v4  ;;  %v6039_v19 = vld [vmem:[%s7236_s1 + $0x170] sm:$0xff]   ;;  %v6054_v22 = vld [vmem:[%s6044_s9 + $0x1c] sm:$0xf]  ;;  %v4004_v23 = vld [vmem:[%s6044_s9 + $0x18] sm:$0xe]  ;;  %p5797_p12 = scmp.ne.s32.totalorder %s7184_s6, %s5796_s15  ;;  %s5876_s18 = smov [#allocation3]  }
  0x1e   : > { %4662 = vmatprep.subr.bf16.mxu0 %v5450_v6  ;;  %5212 = vmatprep.subr.bf16.mxu1 %v5985_v7  ;;  %v5464_v20 = vld [vmem:[%s7236_s1 + $0xf0] sm:$0xff]   ;;  %v6061_v24 = vld [vmem:[%s7236_s1 + $0x178] sm:$0xff]   ;;  %v4100_v25 = vcombine.low %v4004_v23, %v6054_v22  ;;  %v5469_v26 = vld [vmem:[%s6044_s9 + $0x20] ss:$0 sps:$4 sm:$0x11]   ;;  %s5800_s19 = sshll.u32 %s5876_s18, 4  ;;  %s5801_s19 = int_to_ptr.vmem [resolvable:$false] %s5800_s19 }
  0x1f   : > { %v3941_v27 = vld [vmem:[%s6044_s9 + $0x94] sm:$0xf]  ;;  %v4052_v28 = vld [vmem:[%s6044_s9 + $0x90] sm:$0xe]  ;;  %v5467_v29 = vld [vmem:[%s7236_s1 + $0xf8] sm:$0xff]   ;;  %v1068_v31 = vrot.slane %v5469_v26, 1  ;;  %p5798_p13 = pnand %p5797_p12, %p5939_p4  ;;  %p5803_p1 = scmp.lt.s32.totalorder %s7184_s6, %s5801_s19 }
  0x20   : > { %v1067_v30 = vrot.slane %v4100_v25, 1  ;;  %v4148_v32 = vcombine.low %v4052_v28, %v3941_v27  ;;  %v5471_v33 = vld [vmem:[%s6044_s9 + $0x98] ss:$0 sps:$4 sm:$0x11]   ;;  %v6073_v34 = vld [vmem:[%s6044_s9 + $0x4] sm:$0xf] }
  0x21   : > { %4663 = vmatpush3.bf16.msra.mxu0 %v5452_v8  ;;  %5220 = vmatpush3.bf16.msra.mxu1 %v5985_v7  ;;  %v679_v35 = vld [vmem:[%s6044_s9] sm:$0xe]  ;;  %v1143_v38 = vrot.slane %v5471_v33, 1  ;;  %v5474_v39 = vld [vmem:[%s6044_s9 + $0x8] ss:$0 sps:$4 sm:$0x11]   ;;  %p5799_p0 = pneg %p5798_p13 }
  0x22   : > { %4664 = vmatprep.subr.bf16.mxu0 %v5453_v9  ;;  %5213 = vmatprep.subr.bf16.mxu1 %v5999_v10  ;;  %v1069_v36 = vsel %vm1063_vm0, %v1067_v30, %v1068_v31  ;;  %v1142_v37 = vrot.slane %v4148_v32, 1  ;;  %v4068_v41 = vcombine.low %v679_v35, %v6073_v34  ;;  %v3943_v42 = vld [vmem:[%s6044_s9 + $0xa0] sm:$0xf]  ;;  %v4054_v43 = vld [vmem:[%s6044_s9 + $0x9c] sm:$0xe]  ;;  %v1065_v45 = vrot.slane %v5474_v39, 1 }
  0x23   : > { %1481 = vmatprep.mubr.bf16.mxu0 %v1069_v36  ;;  %v4150_v46 = vcombine.low %v4054_v43, %v3943_v42  ;;  %v5476_v47 = vld [vmem:[%s6044_s9 + $0xa4] ss:$0 sps:$4 sm:$0x11]   ;;  %v5479_v50 = vld [vmem:[%s7236_s1 + $0x48] sm:$0xff]   ;;  %v4006_v56 = vld [vmem:[%s6044_s9 + $0x24] sm:$0xe] }
  0x24   : > { %v1144_v44 = vsel %vm1063_vm0, %v1142_v37, %v1143_v38  ;;  %v5478_v48 = vld [vmem:[%s7236_s1] sm:$0xff]   ;;  %v1064_v49 = vrot.slane %v4068_v41, 1  ;;  %v1152_v52 = vrot.slane %v5476_v47, 1  ;;  %v6098_v55 = vld [vmem:[%s6044_s9 + $0x28] sm:$0xf]  ;;  %v5489_v3 = vld [vmem:[%s7236_s1 + $0x50] sm:$0xff]  }
  0x25   : > { %4665 = vmatpush3.bf16.msra.mxu0 %v5455_v11  ;;  %5221 = vmatpush3.bf16.msra.mxu1 %v5999_v10  ;;  %v1151_v51 = vrot.slane %v4150_v46, 1  ;;  %v5480_v57 = vld [vmem:[%s7236_s1 + $0x8] sm:$0xff]   ;;  %v4102_v58 = vcombine.low %v4006_v56, %v6098_v55  ;;  %v6110_v62 = vld [vmem:[%s6044_s9 + $0x10] sm:$0xf]  ;;  %v3947_v6 = vld [vmem:[%s6044_s9 + $0xb8] sm:$0xf] }
  0x26   : > { %4666 = vmatprep.subr.bf16.mxu0 %v5456_v12  ;;  %5214 = vmatprep.subr.bf16.mxu1 %v6012_v13  ;;  %v1066_v53 = vsel %vm1063_vm0, %v1064_v49, %v1065_v45  ;;  %v5482_v59 = vld [vmem:[%s6044_s9 + $0x2c] ss:$0 sps:$4 sm:$0x11]   ;;  %v4056_v61 = vld [vmem:[%s6044_s9 + $0xa8] sm:$0xe]  ;;  %v5491_v26 = vld [vmem:[%s7236_s1 + $0x58] sm:$0xff]  }
  0x27   : > { %5098 = vmatprep.mubr.bf16.mxu1 %v1144_v44  ;;  %v1153_v54 = vsel %vm1063_vm0, %v1151_v51, %v1152_v52  ;;  %v3945_v60 = vld [vmem:[%s6044_s9 + $0xac] sm:$0xf]  ;;  %v1076_v63 = vrot.slane %v4102_v58, 1  ;;  %v1077_v0 = vrot.slane %v5482_v59, 1  ;;  %v6139_v30 = vld [vmem:[%s6044_s9 + $0x34] sm:$0xf] }
  0x28   : > { %v5484_v2 = vld [vmem:[%s6044_s9 + $0xb0] ss:$0 sps:$4 sm:$0x11]   ;;  %v681_v5 = vld [vmem:[%s6044_s9 + $0xc] sm:$0xe]  ;;  %s5802_s21 = scalar_lea.vmem %s5801_s19, 4096 }
  0x29   : > { %4667 = vmatpush3.bf16.msra.mxu0 %v5458_v14  ;;  %5222 = vmatpush3.bf16.msra.mxu1 %v6012_v13  ;;  %v1078_v8 = vsel %vm1063_vm0, %v1076_v63, %v1077_v0  ;;  %v1161_v11 = vrot.slane %v5484_v2, 1  ;;  %v4070_v12 = vcombine.low %v681_v5, %v6110_v62  ;;  %v5486_v14 = vld [vmem:[%s6044_s9 + $0x14] ss:$0 sps:$4 sm:$0x11]   ;;  %v4008_v32 = vld [vmem:[%s6044_s9 + $0x30] sm:$0xe]  ;;  %p5804_p2 = scmp.lt.s32.totalorder %s5802_s21, %s5796_s15 }
  0x2a   : > { %4668 = vmatprep.subr.bf16.mxu0 %v5459_v15  ;;  %5215 = vmatprep.subr.bf16.mxu1 %v6026_v16  ;;  %v5490_v15 = vld [vmem:[%s7236_s1 + $0x10] sm:$0xff]   ;;  %v5488_v25 = vld [vmem:[%s6044_s9 + $0xbc] ss:$0 sps:$4 sm:$0x11]   ;;  %v3949_v33 = vld [vmem:[%s6044_s9 + $0xc4] sm:$0xf]  ;;  %v4104_v35 = vcombine.low %v4008_v32, %v6139_v30 }
  0x2b   : > { %v5494_v36 = vld [vmem:[%s6044_s9 + $0x38] ss:$0 sps:$4 sm:$0x11]   ;;  %v4060_v37 = vld [vmem:[%s6044_s9 + $0xc0] sm:$0xe]  ;;  %v5504_v58 = vld [vmem:[%s7236_s1 + $0x28] sm:$0xff]   ;;  %p5805_p3 = por %p5804_p2, %p5803_p1 }
  0x2c   : > { %v4156_v38 = vcombine.low %v4060_v37, %v3949_v33  ;;  %v5496_v39 = vld [vmem:[%s6044_s9 + $0xc8] ss:$0 sps:$4 sm:$0x11]   ;;  %v1085_v41 = vrot.slane %v4104_v35, 1  ;;  %v1086_v42 = vrot.slane %v5494_v36, 1  ;;  %v5516_v33 = vld [vmem:[%s7236_s1 + $0x38] sm:$0xff]  }
  0x2d   : > { %4669 = vmatpush3.bf16.msra.mxu0 %v5461_v17  ;;  %5223 = vmatpush3.bf16.msra.mxu1 %v6026_v16  ;;  %v4058_v17 = vld [vmem:[%s6044_s9 + $0xb4] sm:$0xe]  ;;  %v6157_v43 = vld [vmem:[%s6044_s9 + $0x1c] sm:$0xf]  ;;  %v683_v44 = vld [vmem:[%s6044_s9 + $0x18] sm:$0xe]  ;;  %p5806_p5 = pnand %p5805_p3, %p5799_p0 }
  0x2e   : > { %4670 = vmatprep.subr.bf16.mxu0 %v5462_v18  ;;  %5216 = vmatprep.subr.bf16.mxu1 %v6039_v19  ;;  %v4154_v23 = vcombine.low %v4058_v17, %v3947_v6  ;;  %v1178_v45 = vrot.slane %v4156_v38, 1  ;;  %v1179_v46 = vrot.slane %v5496_v39, 1  ;;  %v4072_v47 = vcombine.low %v683_v44, %v6157_v43  ;;  %v4062_v51 = vld [vmem:[%s6044_s9 + $0xcc] sm:$0xe]  ;;  %v6179_v63 = vld [vmem:[%s6044_s9 + $0x40] sm:$0xf] }
  0x2f   : > { %v1087_v49 = vsel %vm1063_vm0, %v1085_v41, %v1086_v42  ;;  %v5500_v56 = vld [vmem:[%s6044_s9 + $0xd4] ss:$0 sps:$4 sm:$0x11]   ;;  %v4010_v0 = vld [vmem:[%s6044_s9 + $0x3c] sm:$0xe] }
  0x30   : > { %v1169_v28 = vrot.slane %v4154_v23, 1  ;;  %v1180_v52 = vsel %vm1063_vm0, %v1178_v45, %v1179_v46  ;;  %v5506_v2 = vld [vmem:[%s6044_s9 + $0x44] ss:$0 sps:$4 sm:$0x11]   ;;  %v3953_v5 = vld [vmem:[%s6044_s9 + $0xdc] sm:$0xf] }
  0x31   : > { %4671 = vmatpush3.bf16.msra.mxu0 %v5464_v20  ;;  %5224 = vmatpush3.bf16.msra.mxu1 %v6039_v19  ;;  %v1073_v20 = vrot.slane %v4070_v12, 1  ;;  %v4064_v6 = vld [vmem:[%s6044_s9 + $0xd8] sm:$0xe]  ;;  %v5508_v12 = vld [vmem:[%s6044_s9 + $0xe0] ss:$0 sps:$4 sm:$0x11]  }
  0x32   : > { %4672 = vmatprep.subr.bf16.mxu0 %v5465_v21  ;;  %5217 = vmatprep.subr.bf16.mxu1 %v6061_v24  ;;  %v1074_v21 = vrot.slane %v5486_v14, 1  ;;  %v5514_v14 = vld [vmem:[%s7236_s1 + $0x30] sm:$0xff]   ;;  %v5510_v23 = vld [vmem:[%s6044_s9 + $0x2c] ss:$0 sps:$4 sm:$0x11]  }
  0x33   : > { %v5512_v32 = vld [vmem:[%s6044_s9 + $0xec] ss:$0 sps:$4 sm:$0x11]   ;;  %v245_v37 = vld [vmem:[%s6044_s9] sm:$0xf] }
  0x34   : > { %v1075_v27 = vsel %vm1063_vm0, %v1073_v20, %v1074_v21  ;;  %v1197_v20 = vrot.slane %v5508_v12, 1  ;;  %v1206_v36 = vrot.slane %v5512_v32, 1  ;;  %v6219_v38 = vld [vmem:[%s6044_s9 + $0x4c] sm:$0xf]  ;;  %v4012_v39 = vld [vmem:[%s6044_s9 + $0x48] sm:$0xe] }
  0x35   : > { %4673 = vmatpush3.bf16.msra.mxu0 %v5467_v29  ;;  %5225 = vmatpush3.bf16.msra.mxu1 %v6061_v24  ;;  %v1170_v29 = vrot.slane %v5488_v25, 1  ;;  %v5515_v25 = vld [vmem:[%s7236_s1 + $0x78] sm:$0xff]   ;;  %v5518_v41 = vld [vmem:[%s6044_s9 + $0x50] ss:$0 sps:$4 sm:$0x11]  }
  0x36   : > { %5066 = vmatprep.subr.bf16.mxu0 %v5960_v1  ;;  %4794 = vmatprep.subr.bf16.mxu1 %v5477_v40  ;;  %v5502_v40 = vld [vmem:[%s7236_s1 + $0x20] sm:$0xff]   ;;  %v3892_v42 = vld [vmem:[%s6044_s9 + $0x18] sm:$0xf]  ;;  %v6230_v45 = vld [vmem:[%s6044_s9 + $0x34] sm:$0xf] }
  0x37   : > { %v1171_v31 = vsel %vm1063_vm0, %v1169_v28, %v1170_v29  ;;  %v1092_v29 = vrot.slane %v5510_v23, 1  ;;  %v3972_v44 = vcombine.low %v3892_v42, %v6054_v22  ;;  %v687_v46 = vld [vmem:[%s6044_s9 + $0x30] sm:$0xe]  ;;  %v5561_v32 = vld [vmem:[%s7236_s1 + $0x98] sm:$0xff]   ;;  %v5574_v42 = vld [vmem:[%s7236_s1 + $0xa0] sm:$0xff]  }
  0x38   : > { %1482 = vmatmul.mubr.bf16.vlgmr.msra.gmra.mrb[0].mxu0 %v1066_v53  ;;  %5099 = vmatmul.mubr.bf16.vlgmr.msra.gmra.mrb[0].mxu1 %v1153_v54  ;;  %v1082_v53 = vrot.slane %v4072_v47, 1  ;;  %v3896_v12 = vld [vmem:[%s6044_s9 + $0x30] sm:$0xf] }
  0x39   : > { %5067 = vmatpush3.bf16.msra.mxu0 %v5960_v1  ;;  %4795 = vmatpush3.bf16.msra.mxu1 %v5478_v48  ;;  %v4152_v1 = vcombine.low %v4056_v61, %v3945_v60  ;;  %v3951_v48 = vld [vmem:[%s6044_s9 + $0xd0] sm:$0xf]  ;;  %v1188_v60 = vrot.slane %v5500_v56, 1 }
  0x3a   : > { %5068 = vmatprep.subr.bf16.mxu0 %v5973_v4  ;;  %4796 = vmatprep.subr.bf16.mxu1 %v5479_v50  ;;  %v5498_v50 = vld [vmem:[%s6044_s9 + $0x20] ss:$0 sps:$4 sm:$0x11]   ;;  %v4158_v54 = vcombine.low %v4062_v51, %v3951_v48  ;;  %v1104_v48 = vrot.slane %v5518_v41, 1  ;;  %v6236_v51 = vld [vmem:[%s6044_s9 + $0x58] sm:$0xf] }
  0x3b   : > { %v1160_v9 = vrot.slane %v4152_v1, 1  ;;  %1489 = vmatprep.mubr.bf16.mxu0 %v1078_v8  ;;  %v4106_v1 = vcombine.low %v4010_v0, %v6179_v63 }
  0x3c   : > { %v1187_v59 = vrot.slane %v4158_v54, 1  ;;  %v4014_v54 = vld [vmem:[%s6044_s9 + $0x54] sm:$0xe] }
  0x3d   : > { %5069 = vmatpush3.bf16.msra.mxu0 %v5973_v4  ;;  %4797 = vmatpush3.bf16.msra.mxu1 %v5480_v57  ;;  %v1162_v18 = vsel %vm1063_vm0, %v1160_v9, %v1161_v11  ;;  %v5492_v4 = vld [vmem:[%s7236_s1 + $0x18] sm:$0xff]   ;;  %v1083_v57 = vrot.slane %v5498_v50, 1  ;;  %v1094_v8 = vrot.slane %v4106_v1, 1  ;;  %v1095_v9 = vrot.slane %v5506_v2, 1 }
  0x3e   : > { %4798 = vmatprep.subr.bf16.mxu1 %v5489_v3  ;;  %5070 = vmatprep.subr.bf16.mxu0 %v5985_v7  ;;  %v5513_v3 = vld [vmem:[%s7236_s1 + $0x70] sm:$0xff]   ;;  %v4160_v11 = vcombine.low %v4064_v6, %v3953_v5  ;;  %v5521_v50 = vld [vmem:[%s6044_s9 + $0x38] ss:$0 sps:$4 sm:$0x11]   ;;  %v4110_v56 = vcombine.low %v4014_v54, %v6236_v51  ;;  %v247_v5 = vld [vmem:[%s6044_s9 + $0xc] sm:$0xf] }
  0x3f   : > { %5102 = vmatprep.mubr.bf16.mxu1 %v1162_v18  ;;  %v1084_v61 = vsel %vm1063_vm0, %v1082_v53, %v1083_v57  ;;  %v1096_v17 = vsel %vm1063_vm0, %v1094_v8, %v1095_v9  ;;  %v1101_v53 = vrot.slane %v5521_v50, 1  ;;  %v5524_v57 = vld [vmem:[%s6044_s9 + $0x5c] ss:$0 sps:$4 sm:$0x11]   ;;  %v6257_v6 = vld [vmem:[%s6044_s9 + $0x64] sm:$0xf] }
  0x40   : > { %1490 = vmatmul.mubr.bf16.gmra.mrb[4].mxu0 %v1075_v27  ;;  %5103 = vmatmul.mubr.bf16.gmra.mrb[4].mxu1 %v1171_v31  ;;  %v1196_v18 = vrot.slane %v4160_v11, 1  ;;  %v1112_v0 = vrot.slane %v4110_v56, 1  ;;  %v1113_v1 = vrot.slane %v5524_v57, 1  ;;  %v4016_v8 = vld [vmem:[%s6044_s9 + $0x60] sm:$0xe]  ;;  %v5587_v54 = vld [vmem:[%s7236_s1 + $0xa8] sm:$0xff]  }
  0x41   : > { %5071 = vmatpush3.bf16.msra.mxu0 %v5985_v7  ;;  %4799 = vmatpush3.bf16.msra.mxu1 %v5490_v15  ;;  %v5501_v7 = vld [vmem:[%s7236_s1 + $0x60] sm:$0xff]   ;;  %v6196_v15 = vld [vmem:[%s6044_s9 + $0x28] sm:$0xf] }
  0x42   : > { %4800 = vmatprep.subr.bf16.mxu1 %v5491_v26  ;;  %5072 = vmatprep.subr.bf16.mxu0 %v5999_v10  ;;  %v3955_v26 = vld [vmem:[%s6044_s9 + $0xe8] sm:$0xf]  ;;  %v1198_v27 = vsel %vm1063_vm0, %v1196_v18, %v1197_v20  ;;  %v5548_v18 = vld [vmem:[%s7236_s1 + $0x90] sm:$0xff]   ;;  %v3957_v20 = vcombine.low %v247_v5, %v6110_v62  ;;  %v4018_v62 = vld [vmem:[%s6044_s9 + $0x6c] sm:$0xe] }
  0x43   : > { %1497 = vmatprep.mubr.bf16.mxu0 %v1087_v49  ;;  %5106 = vmatprep.mubr.bf16.mxu1 %v1180_v52  ;;  %v4076_v49 = vcombine.low %v687_v46, %v6230_v45  ;;  %v4020_v46 = vld [vmem:[%s6044_s9 + $0x78] sm:$0xe] }
  0x45   : > { %5073 = vmatpush3.bf16.msra.mxu0 %v5999_v10  ;;  %4801 = vmatpush3.bf16.msra.mxu1 %v5492_v4  ;;  %v5503_v10 = vld [vmem:[%s7236_s1 + $0x68] sm:$0xff]   ;;  %v4066_v4 = vld [vmem:[%s6044_s9 + $0xe4] sm:$0xe]  ;;  %v1100_v52 = vrot.slane %v4076_v49, 1 }
  0x46   : > { %5074 = vmatprep.subr.bf16.mxu0 %v6012_v13  ;;  %4802 = vmatprep.subr.bf16.mxu1 %v5501_v7  ;;  %v4162_v31 = vcombine.low %v4066_v4, %v3955_v26 }
  0x48   : > { %1498 = vmatmul.mubr.bf16.gmra.mrb[8].mxu0 %v1084_v61  ;;  %v1205_v35 = vrot.slane %v4162_v31, 1  ;;  %v6250_v61 = vld [vmem:[%s6044_s9 + $0x40] sm:$0xf] }
  0x49   : > { %5075 = vmatpush3.bf16.msra.mxu0 %v6012_v13  ;;  %4803 = vmatpush3.bf16.msra.mxu1 %v5502_v40  ;;  %v1189_v13 = vsel %vm1063_vm0, %v1187_v59, %v1188_v60  ;;  %v4108_v40 = vcombine.low %v4012_v39, %v6219_v38  ;;  %v5535_v59 = vld [vmem:[%s7236_s1 + $0x88] sm:$0xff]   ;;  %v249_v39 = vld [vmem:[%s6044_s9 + $0x18] sm:$0xf] }
  0x4a   : > { %4804 = vmatprep.subr.bf16.mxu1 %v5503_v10  ;;  %5076 = vmatprep.subr.bf16.mxu0 %v6026_v16  ;;  %v1207_v7 = vsel %vm1063_vm0, %v1205_v35, %v1206_v36  ;;  %v3956_v10 = vcombine.low %v245_v37, %v6073_v34  ;;  %v1102_v34 = vsel %vm1063_vm0, %v1100_v52, %v1101_v53  ;;  %v5537_v35 = vld [vmem:[%s6044_s9 + $0x74] ss:$0 sps:$4 sm:$0x11]   ;;  %v5600_v36 = vld [vmem:[%s7236_s1 + $0x1c0] sm:$0xff]   ;;  %v6290_v37 = vld [vmem:[%s6044_s9 + $0x58] sm:$0xf] }
  0x4b   : > { %5107 = vmatmul.mubr.bf16.gmra.mrb[8].mxu1 %v1189_v13  ;;  %1505 = vmatprep.mubr.bf16.mxu0 %v1096_v17  ;;  %v1103_v47 = vrot.slane %v4108_v40, 1  ;;  %v689_v13 = vld [vmem:[%s6044_s9 + $0x3c] sm:$0xe]  ;;  %v6265_v17 = vld [vmem:[%s6044_s9 + $0x4c] sm:$0xf]  ;;  %v1131_v41 = vrot.slane %v5537_v35, 1  ;;  %v3958_v50 = vcombine.low %v249_v39, %v6157_v43 }
  0x4c   : > { %5110 = vmatprep.mubr.bf16.mxu1 %v1198_v27  ;;  %v4078_v2 = vcombine.low %v689_v13, %v6250_v61  ;;  %v5533_v27 = vld [vmem:[%s6044_s9 + $0x50] ss:$0 sps:$4 sm:$0x11]   ;;  %v5543_v53 = vld [vmem:[%s6044_s9 + $0x80] ss:$0 sps:$4 sm:$0x11]  }
  0x4d   : > { %5077 = vmatpush3.bf16.msra.mxu0 %v6026_v16  ;;  %4805 = vmatpush3.bf16.msra.mxu1 %v5504_v58  ;;  %v685_v16 = vld [vmem:[%s6044_s9 + $0x24] sm:$0xe]  ;;  %v1105_v22 = vsel %vm1063_vm0, %v1103_v47, %v1104_v48  ;;  %v5540_v48 = vld [vmem:[%s6044_s9 + $0x5c] ss:$0 sps:$4 sm:$0x11]   ;;  %v5602_v13 = vld [vmem:[%s7236_s1 + $0xb0] sm:$0xff]  }
  0x4e   : > { %5078 = vmatprep.subr.bf16.mxu0 %v6039_v19  ;;  %4806 = vmatprep.subr.bf16.mxu1 %v5513_v3  ;;  %v4074_v21 = vcombine.low %v685_v16, %v6196_v15  ;;  %v3894_v58 = vld [vmem:[%s6044_s9 + $0x24] sm:$0xf]  ;;  %v1109_v9 = vrot.slane %v4078_v2, 1  ;;  %v5530_v16 = vld [vmem:[%s6044_s9 + $0x68] ss:$0 sps:$4 sm:$0x11]  }
  0x4f   : > { %v3973_v60 = vcombine.low %v3894_v58, %v6098_v55  ;;  %v5527_v3 = vld [vmem:[%s6044_s9 + $0x44] ss:$0 sps:$4 sm:$0x11]   ;;  %v1114_v55 = vsel %vm1063_vm0, %v1112_v0, %v1113_v1  ;;  %v1122_v26 = vrot.slane %v5530_v16, 1  ;;  %v1128_v57 = vrot.slane %v5540_v48, 1 }
  0x50   : > { %v1091_v28 = vrot.slane %v4074_v21, 1  ;;  %v1110_v11 = vrot.slane %v5527_v3, 1  ;;  %v691_v21 = vld [vmem:[%s6044_s9 + $0x48] sm:$0xe]  ;;  %v251_v43 = vld [vmem:[%s6044_s9 + $0x24] sm:$0xf] }
  0x51   : > { %5079 = vmatpush3.bf16.msra.mxu0 %v6039_v19  ;;  %4807 = vmatpush3.bf16.msra.mxu1 %v5514_v14  ;;  %v4112_v14 = vcombine.low %v4016_v8, %v6257_v6  ;;  %v4080_v4 = vcombine.low %v691_v21, %v6265_v17  ;;  %v695_v58 = vld [vmem:[%s6044_s9 + $0x60] sm:$0xe]  ;;  %v6323_v0 = vld [vmem:[%s6044_s9 + $0x88] sm:$0xf]  ;;  %v4022_v1 = vld [vmem:[%s6044_s9 + $0x84] sm:$0xe]  ;;  %v3959_v8 = vcombine.low %v251_v43, %v6196_v15 }
  0x52   : > { %4808 = vmatprep.subr.bf16.mxu1 %v5515_v25  ;;  %5080 = vmatprep.subr.bf16.mxu0 %v6061_v24  ;;  %v1093_v19 = vsel %vm1063_vm0, %v1091_v28, %v1092_v29  ;;  %v1111_v23 = vsel %vm1063_vm0, %v1109_v9, %v1110_v11  ;;  %v3974_v28 = vcombine.low %v3896_v12, %v6139_v30  ;;  %v6277_v29 = vld [vmem:[%s6044_s9 + $0x70] sm:$0xf]  ;;  %v5546_v3 = vld [vmem:[%s6044_s9 + $0x68] ss:$0 sps:$4 sm:$0x11]  }
  0x53   : > { %1506 = vmatmul.mubr.bf16.gmra.mrb[12].mxu0 %v1093_v19  ;;  %5111 = vmatmul.mubr.bf16.gmra.mrb[12].mxu1 %v1207_v7  ;;  %v1121_v25 = vrot.slane %v4112_v14, 1  ;;  %v1119_v19 = vrot.slane %v5533_v27, 1  ;;  %v4114_v30 = vcombine.low %v4018_v62, %v6277_v29  ;;  %v693_v7 = vld [vmem:[%s6044_s9 + $0x54] sm:$0xe]  ;;  %v4118_v11 = vcombine.low %v4022_v1, %v6323_v0  ;;  %v6337_v15 = vld [vmem:[%s6044_s9 + $0x70] sm:$0xf] }
  0x54   : > { %1947 = vmatprep.mubr.bf16.mxu1 %v3972_v44  ;;  %1513 = vmatprep.mubr.bf16.mxu0 %v1105_v22  ;;  %v6299_v44 = vld [vmem:[%s6044_s9 + $0x7c] sm:$0xf]  ;;  %v4082_v47 = vcombine.low %v693_v7, %v6290_v37  ;;  %v5550_v12 = vld [vmem:[%s6044_s9 + $0x8c] ss:$0 sps:$4 sm:$0x11]   ;;  %v1137_v16 = vrot.slane %v5546_v3, 1 }
  0x55   : > { %5081 = vmatpush3.bf16.msra.mxu0 %v6061_v24  ;;  %4809 = vmatpush3.bf16.msra.mxu1 %v5516_v33  ;;  %v5522_v24 = vld [vmem:[%s7236_s1 + $0x80] sm:$0xff]   ;;  %v1123_v31 = vsel %vm1063_vm0, %v1121_v25, %v1122_v26  ;;  %v1118_v33 = vrot.slane %v4080_v4, 1  ;;  %v1130_v40 = vrot.slane %v4114_v30, 1  ;;  %v4116_v52 = vcombine.low %v4020_v46, %v6299_v44  ;;  %v697_v21 = vld [vmem:[%s6044_s9 + $0x6c] sm:$0xe] }
  0x56   : > { %5114 = vmatprep.subr.bf16.mxu1 %v5522_v24  ;;  %4930 = vmatprep.subr.bf16.mxu0 %v5600_v36  ;;  %v1127_v56 = vrot.slane %v4082_v47, 1  ;;  %v6341_v25 = vld [vmem:[%s6044_s9 + $0x94] sm:$0xf]  ;;  %v4024_v26 = vld [vmem:[%s6044_s9 + $0x90] sm:$0xe] }
  0x57   : > { %v1120_v49 = vsel %vm1063_vm0, %v1118_v33, %v1119_v19  ;;  %v4120_v33 = vcombine.low %v4024_v26, %v6341_v25  ;;  %v5556_v19 = vld [vmem:[%s6044_s9 + $0x98] ss:$0 sps:$4 sm:$0x11]   ;;  %v255_v30 = vld [vmem:[%s6044_s9 + $0x3c] sm:$0xf] }
  0x58   : > { %v1129_v5 = vsel %vm1063_vm0, %v1127_v56, %v1128_v57  ;;  %v3904_v36 = vld [vmem:[%s6044_s9 + $0x60] sm:$0xf]  ;;  %v6355_v7 = vld [vmem:[%s6044_s9 + $0x7c] sm:$0xf]  ;;  %v3961_v47 = vcombine.low %v255_v30, %v6250_v61  ;;  %v6375_v56 = vld [vmem:[%s6044_s9 + $0x88] sm:$0xf] }
  0x59   : > { %v1157_v39 = vrot.slane %v4120_v33, 1  ;;  %v701_v43 = vld [vmem:[%s6044_s9 + $0x84] sm:$0xe]  ;;  %v5569_v3 = vld [vmem:[%s6044_s9 + $0xb0] ss:$0 sps:$4 sm:$0x11]  }
  0x5a   : > { %v6410_v33 = vld [vmem:[%s6044_s9 + $0xa0] sm:$0xf] }
  0x5b   : > { %1514 = vmatmul.mubr.bf16.gmra.mrb[16].mxu0 %v1102_v34  ;;  %1948 = vmatmul.mubr.bf16.vlgmr.msra.gmra.mrb[16].mxu1 %v3956_v10  ;;  %v1132_v10 = vsel %vm1063_vm0, %v1130_v40, %v1131_v41  ;;  %v1140_v34 = vrot.slane %v5543_v53, 1  ;;  %v1158_v40 = vrot.slane %v5556_v19, 1  ;;  %v699_v41 = vld [vmem:[%s6044_s9 + $0x78] sm:$0xe]  ;;  %v705_v19 = vld [vmem:[%s6044_s9 + $0x9c] sm:$0xe] }
  0x5c   : > { %5115 = vmatpush3.bf16.msra.mxu1 %v5522_v24  ;;  %1955 = vmatprep.mubr.bf16.mxu1 %v3973_v60  ;;  %v3898_v24 = vld [vmem:[%s6044_s9 + $0x3c] sm:$0xf]  ;;  %v3900_v60 = vld [vmem:[%s6044_s9 + $0x48] sm:$0xf]  ;;  %v4088_v48 = vcombine.low %v699_v41, %v6355_v7 }
  0x5d   : > { %1521 = vmatprep.mubr.bf16.mxu0 %v1114_v55  ;;  %5116 = vmatprep.subr.bf16.mxu1 %v5535_v59  ;;  %v3975_v22 = vcombine.low %v3898_v24, %v6179_v63  ;;  %v6315_v63 = vld [vmem:[%s6044_s9 + $0x64] sm:$0xf]  ;;  %v3976_v9 = vcombine.low %v3900_v60, %v6219_v38  ;;  %v1148_v38 = vrot.slane %v4118_v11, 1  ;;  %v5623_v24 = vld [vmem:[%s7236_s1 + $0xb8] sm:$0xff]   ;;  %v703_v11 = vld [vmem:[%s6044_s9 + $0x90] sm:$0xe] }
  0x5e   : > { %v4084_v2 = vcombine.low %v695_v58, %v6315_v63  ;;  %v1154_v61 = vrot.slane %v4088_v48, 1  ;;  %v3906_v58 = vld [vmem:[%s6044_s9 + $0x6c] sm:$0xf]  ;;  %v5582_v41 = vld [vmem:[%s6044_s9 + $0xc8] ss:$0 sps:$4 sm:$0x11]  }
  0x5f   : > { %v5566_v60 = vld [vmem:[%s6044_s9 + $0x8c] ss:$0 sps:$4 sm:$0x11]  }
  0x60   : > { %5117 = vmatpush3.bf16.msra.mxu1 %v5535_v59  ;;  %v1139_v59 = vrot.slane %v4116_v52, 1  ;;  %v1136_v14 = vrot.slane %v4084_v2, 1  ;;  %v5563_v52 = vld [vmem:[%s6044_s9 + $0xa4] ss:$0 sps:$4 sm:$0x11]   ;;  %v4090_v2 = vcombine.low %v701_v43, %v6375_v56 }
  0x61   : > { %5118 = vmatprep.subr.bf16.mxu1 %v5548_v18  ;;  %v1167_v57 = vrot.slane %v5563_v52, 1  ;;  %v6434_v52 = vld [vmem:[%s6044_s9 + $0xac] sm:$0xf]  ;;  %v5585_v43 = vld [vmem:[%s6044_s9 + $0xb0] ss:$0 sps:$4 sm:$0x11]  }
  0x62   : > { %v1141_v55 = vsel %vm1063_vm0, %v1139_v59, %v1140_v34  ;;  %v1138_v4 = vsel %vm1063_vm0, %v1136_v14, %v1137_v16  ;;  %v6380_v59 = vld [vmem:[%s6044_s9 + $0xac] sm:$0xf]  ;;  %v4028_v34 = vld [vmem:[%s6044_s9 + $0xa8] sm:$0xe]  ;;  %v259_v14 = vld [vmem:[%s6044_s9 + $0x54] sm:$0xf] }
  0x63   : > { %1522 = vmatmul.mubr.bf16.gmra.mrb[20].mxu0 %v1111_v23  ;;  %1956 = vmatmul.mubr.bf16.gmra.mrb[20].mxu1 %v3957_v20  ;;  %v3902_v20 = vld [vmem:[%s6044_s9 + $0x54] sm:$0xf]  ;;  %v1149_v23 = vrot.slane %v5550_v12, 1  ;;  %v1164_v12 = vrot.slane %v5566_v60, 1 }
  0x64   : > { %1529 = vmatprep.mubr.bf16.mxu0 %v1123_v31  ;;  %1963 = vmatprep.mubr.bf16.mxu1 %v3974_v28  ;;  %v4086_v28 = vcombine.low %v697_v21, %v6337_v15  ;;  %v5553_v31 = vld [vmem:[%s6044_s9 + $0x74] ss:$0 sps:$4 sm:$0x11]   ;;  %v4030_v21 = vld [vmem:[%s6044_s9 + $0xb4] sm:$0xe] }
  0x65   : > { %5119 = vmatpush3.bf16.msra.mxu1 %v5548_v18  ;;  %v253_v18 = vld [vmem:[%s6044_s9 + $0x30] sm:$0xf]  ;;  %v1150_v62 = vsel %vm1063_vm0, %v1148_v38, %v1149_v23  ;;  %v3908_v38 = vld [vmem:[%s6044_s9 + $0x78] sm:$0xf] }
  0x66   : > { %5120 = vmatprep.subr.bf16.mxu1 %v5561_v32  ;;  %v3960_v27 = vcombine.low %v253_v18, %v6230_v45  ;;  %v1145_v35 = vrot.slane %v4086_v28, 1  ;;  %v1146_v45 = vrot.slane %v5553_v31, 1  ;;  %v5572_v23 = vld [vmem:[%s6044_s9 + $0x98] ss:$0 sps:$4 sm:$0x11]  }
  0x67   : > { %v5576_v31 = vld [vmem:[%s6044_s9 + $0xbc] ss:$0 sps:$4 sm:$0x11]   ;;  %v1173_v30 = vrot.slane %v5572_v23, 1 }
  0x68   : > { %v1147_v46 = vsel %vm1063_vm0, %v1145_v35, %v1146_v45  ;;  %v6414_v35 = vld [vmem:[%s6044_s9 + $0xc4] sm:$0xf]  ;;  %v4032_v45 = vld [vmem:[%s6044_s9 + $0xc0] sm:$0xe] }
  0x69   : > { %5121 = vmatpush3.bf16.msra.mxu1 %v5561_v32  ;;  %v3977_v32 = vcombine.low %v3902_v20, %v6236_v51  ;;  %v6359_v51 = vld [vmem:[%s6044_s9 + $0xa0] sm:$0xf]  ;;  %v1176_v20 = vrot.slane %v5569_v3, 1  ;;  %v5589_v60 = vld [vmem:[%s6044_s9 + $0xd4] ss:$0 sps:$4 sm:$0x11]  }
  0x6a   : > { %5122 = vmatprep.subr.bf16.mxu1 %v5574_v42 }
  0x6b   : > { %1530 = vmatmul.mubr.bf16.gmra.mrb[24].mxu0 %v1120_v49  ;;  %1964 = vmatmul.mubr.bf16.gmra.mrb[24].mxu1 %v3958_v50  ;;  %v5559_v49 = vld [vmem:[%s6044_s9 + $0x80] ss:$0 sps:$4 sm:$0x11]   ;;  %v1159_v50 = vsel %vm1063_vm0, %v1157_v39, %v1158_v40  ;;  %v5579_v39 = vld [vmem:[%s6044_s9 + $0xa4] ss:$0 sps:$4 sm:$0x11]  }
  0x6c   : > { %1537 = vmatprep.mubr.bf16.mxu0 %v1132_v10  ;;  %1971 = vmatprep.mubr.bf16.mxu1 %v3975_v22  ;;  %v3978_v10 = vcombine.low %v3904_v36, %v6257_v6  ;;  %v1155_v53 = vrot.slane %v5559_v49, 1  ;;  %v261_v36 = vld [vmem:[%s6044_s9 + $0x60] sm:$0xf]  ;;  %v1185_v40 = vrot.slane %v5576_v31, 1 }
  0x6d   : > { %5123 = vmatpush3.bf16.msra.mxu1 %v5574_v42  ;;  %v4026_v42 = vld [vmem:[%s6044_s9 + $0x9c] sm:$0xe]  ;;  %v3964_v48 = vcombine.low %v261_v36, %v6315_v63  ;;  %v4034_v63 = vld [vmem:[%s6044_s9 + $0xcc] sm:$0xe]  ;;  %v4040_v36 = vld [vmem:[%s6044_s9 + $0x48] sm:$0xe] }
  0x6e   : > { %5124 = vmatprep.subr.bf16.mxu1 %v5587_v54  ;;  %v4122_v22 = vcombine.low %v4026_v42, %v6359_v51  ;;  %v4094_v42 = vcombine.low %v705_v19, %v6410_v33 }
  0x70   : > { %v1166_v6 = vrot.slane %v4122_v22, 1  ;;  %v1182_v22 = vrot.slane %v5579_v39, 1 }
  0x71   : > { %5125 = vmatpush3.bf16.msra.mxu1 %v5587_v54  ;;  %v257_v54 = vld [vmem:[%s6044_s9 + $0x48] sm:$0xf] }
  0x72   : > { %5126 = vmatprep.subr.bf16.mxu1 %v5602_v13  ;;  %v3962_v1 = vcombine.low %v257_v54, %v6265_v17  ;;  %v1163_v17 = vrot.slane %v4090_v2, 1  ;;  %v707_v54 = vld [vmem:[%s6044_s9 + $0xa8] sm:$0xe] }
  0x73   : > { %1538 = vmatmul.mubr.bf16.gmra.mrb[28].mxu0 %v1129_v5  ;;  %1972 = vmatmul.mubr.bf16.gmra.mrb[28].mxu1 %v3959_v8  ;;  %v6389_v5 = vld [vmem:[%s6044_s9 + $0x94] sm:$0xf]  ;;  %v1168_v8 = vsel %vm1063_vm0, %v1166_v6, %v1167_v57  ;;  %v6438_v6 = vld [vmem:[%s6044_s9 + $0xd0] sm:$0xf]  ;;  %v263_v57 = vld [vmem:[%s6044_s9 + $0x6c] sm:$0xf] }
  0x74   : > { %1545 = vmatprep.mubr.bf16.mxu0 %v1141_v55  ;;  %1979 = vmatprep.mubr.bf16.mxu1 %v3976_v9  ;;  %v3979_v55 = vcombine.low %v3906_v58, %v6277_v29  ;;  %v4124_v9 = vcombine.low %v4028_v34, %v6380_v59  ;;  %v4092_v16 = vcombine.low %v703_v11, %v6389_v5  ;;  %v6398_v29 = vld [vmem:[%s6044_s9 + $0xb8] sm:$0xf]  ;;  %v3912_v58 = vld [vmem:[%s6044_s9 + $0x90] sm:$0xf]  ;;  %v709_v11 = vld [vmem:[%s6044_s9 + $0xb4] sm:$0xe] }
  0x75   : > { %5127 = vmatpush3.bf16.msra.mxu1 %v5602_v13  ;;  %v1156_v13 = vsel %vm1063_vm0, %v1154_v61, %v1155_v53  ;;  %v1165_v26 = vsel %vm1063_vm0, %v1163_v17, %v1164_v12  ;;  %v4126_v28 = vcombine.low %v4030_v21, %v6398_v29  ;;  %v1194_v53 = vrot.slane %v5582_v41, 1  ;;  %v265_v17 = vld [vmem:[%s6044_s9 + $0x78] sm:$0xf]  ;;  %v5598_v41 = vld [vmem:[%s6044_s9 + $0x44] ss:$0 sps:$4 sm:$0x11]  }
  0x76   : > { %5128 = vmatprep.subr.bf16.mxu1 %v5623_v24  ;;  %v1175_v18 = vrot.slane %v4124_v9, 1  ;;  %v4130_v34 = vcombine.low %v4034_v63, %v6438_v6  ;;  %v3982_v3 = vcombine.low %v3912_v58, %v6341_v25  ;;  %v6452_v9 = vld [vmem:[%s6044_s9 + $0xb8] sm:$0xf]  ;;  %v5601_v63 = vld [vmem:[%s7236_s1 + $0x180] sm:$0xff]  }
  0x77   : > { %v4098_v25 = vcombine.low %v709_v11, %v6452_v9  ;;  %v5609_v58 = vld [vmem:[%s6044_s9 + $0x5c] ss:$0 sps:$4 sm:$0x11]  }
  0x78   : > { %v1202_v12 = vrot.slane %v4130_v34, 1  ;;  %v5603_v34 = vld [vmem:[%s7236_s1 + $0x1c8] sm:$0xff]   ;;  %v271_v11 = vld [vmem:[%s6044_s9 + $0x9c] sm:$0xf] }
  0x79   : > { %5129 = vmatpush3.bf16.msra.mxu1 %v5623_v24  ;;  %v3910_v24 = vld [vmem:[%s6044_s9 + $0x84] sm:$0xf] }
  0x7b   : > { %1546 = vmatmul.mubr.bf16.gmra.mrb[32].mxu0 %v1138_v4  ;;  %1980 = vmatmul.mubr.bf16.gmra.mrb[32].mxu1 %v3960_v27  ;;  %v3963_v4 = vcombine.low %v259_v14, %v6290_v37  ;;  %v1172_v27 = vrot.slane %v4092_v16, 1  ;;  %v6420_v37 = vld [vmem:[%s7236_s1 + $0x200] sm:$0xff]   ;;  %v1203_v14 = vrot.slane %v5589_v60, 1  ;;  %v5592_v16 = vld [vmem:[%s6044_s9 + $0xbc] ss:$0 sps:$4 sm:$0x11]  }
  0x7c   : > { %1553 = vmatprep.mubr.bf16.mxu0 %v1150_v62  ;;  %1987 = vmatprep.mubr.bf16.mxu1 %v3977_v32  ;;  %v1177_v62 = vsel %vm1063_vm0, %v1175_v18, %v1176_v20  ;;  %v3980_v32 = vcombine.low %v3908_v38, %v6299_v44  ;;  %v1184_v44 = vrot.slane %v4126_v28, 1  ;;  %v6460_v18 = vld [vmem:[%s6044_s9 + $0x34] sm:$0xf]  ;;  %v4036_v20 = vld [vmem:[%s6044_s9 + $0x30] sm:$0xe]  ;;  %v3966_v38 = vcombine.low %v265_v17, %v6355_v7 }
  0x7d   : > { %5162 = vmatprep.subr.bf16.mxu1 %v6420_v37  ;;  %v1204_v23 = vsel %vm1063_vm0, %v1202_v12, %v1203_v14  ;;  %v1199_v28 = vrot.slane %v4098_v25, 1  ;;  %v1200_v31 = vrot.slane %v5592_v16, 1  ;;  %v5616_v60 = vld [vmem:[%s6044_s9 + $0x68] ss:$0 sps:$4 sm:$0x11]  }
  0x7e   : > { %v1186_v49 = vsel %vm1063_vm0, %v1184_v44, %v1185_v40  ;;  %v4046_v17 = vld [vmem:[%s6044_s9 + $0x6c] sm:$0xe]  ;;  %v1107_v14 = vrot.slane %v5616_v60, 1  ;;  %v6524_v16 = vld [vmem:[%s6044_s9 + $0x7c] sm:$0xf] }
  0x7f   : > { %v1201_v39 = vsel %vm1063_vm0, %v1199_v28, %v1200_v31  ;;  %v4048_v25 = vld [vmem:[%s6044_s9 + $0x78] sm:$0xe] }
  0x80   : > { %v4144_v31 = vcombine.low %v4048_v25, %v6524_v16 }
  0x83   : > { %1554 = vmatmul.mubr.bf16.gmra.mrb[36].mxu0 %v1147_v46  ;;  %1988 = vmatmul.mubr.bf16.gmra.mrb[36].mxu1 %v3961_v47  ;;  %v4128_v46 = vcombine.low %v4032_v45, %v6414_v35  ;;  %v1174_v47 = vsel %vm1063_vm0, %v1172_v27, %v1173_v30  ;;  %v5595_v27 = vld [vmem:[%s6044_s9 + $0x38] ss:$0 sps:$4 sm:$0x11]   ;;  %v4038_v30 = vld [vmem:[%s6044_s9 + $0x3c] sm:$0xe] }
  0x84   : > { %1561 = vmatprep.mubr.bf16.mxu0 %v1159_v50  ;;  %1995 = vmatprep.mubr.bf16.mxu1 %v3978_v10  ;;  %v3981_v50 = vcombine.low %v3910_v24, %v6323_v0  ;;  %v1181_v10 = vrot.slane %v4094_v42, 1  ;;  %v4096_v0 = vcombine.low %v707_v54, %v6434_v52  ;;  %v1071_v19 = vrot.slane %v5595_v27, 1  ;;  %v3916_v45 = vld [vmem:[%s6044_s9 + $0xa8] sm:$0xf]  ;;  %v4044_v54 = vld [vmem:[%s6044_s9 + $0x60] sm:$0xe] }
  0x85   : > { %v1193_v61 = vrot.slane %v4128_v46, 1  ;;  %v3984_v24 = vcombine.low %v3916_v45, %v6380_v59  ;;  %v6494_v59 = vld [vmem:[%s6044_s9 + $0x64] sm:$0xf]  ;;  %v5627_v27 = vld [vmem:[%s6044_s9 + $0x80] ss:$0 sps:$4 sm:$0x11]  }
  0x86   : > { %v273_v45 = vld [vmem:[%s6044_s9 + $0xa8] sm:$0xf] }
  0x87   : > { %v1195_v2 = vsel %vm1063_vm0, %v1193_v61, %v1194_v53  ;;  %v3918_v53 = vld [vmem:[%s6044_s9 + $0xb4] sm:$0xf] }
  0x8b   : > { %1562 = vmatmul.mubr.bf16.gmra.mrb[40].mxu0 %v1156_v13  ;;  %1996 = vmatmul.mubr.bf16.gmra.mrb[40].mxu1 %v3962_v1  ;;  %v1183_v13 = vsel %vm1063_vm0, %v1181_v10, %v1182_v22  ;;  %v3965_v1 = vcombine.low %v263_v57, %v6337_v15  ;;  %v3914_v15 = vld [vmem:[%s6044_s9 + $0x9c] sm:$0xf]  ;;  %v4042_v10 = vld [vmem:[%s6044_s9 + $0x54] sm:$0xe] }
  0x8c   : > { %1569 = vmatprep.mubr.bf16.mxu0 %v1168_v8  ;;  %2003 = vmatprep.mubr.bf16.mxu1 %v3979_v55  ;;  %v1190_v8 = vrot.slane %v4096_v0, 1  ;;  %v1191_v55 = vrot.slane %v5585_v43, 1 }
  0x8e   : > { %v1192_v21 = vsel %vm1063_vm0, %v1190_v8, %v1191_v55  ;;  %v1098_v55 = vrot.slane %v5609_v58, 1  ;;  %v4262_v58 = vld [vmem:[%s6044_s9 + $0x24] sm:$0xc] }
  0x93   : > { %1570 = vmatmul.mubr.bf16.gmra.mrb[44].mxu0 %v1165_v26  ;;  %2004 = vmatmul.mubr.bf16.gmra.mrb[44].mxu1 %v3963_v4  ;;  %v3983_v26 = vcombine.low %v3914_v15, %v6359_v51  ;;  %v4132_v4 = vcombine.low %v4036_v20, %v6460_v18  ;;  %v6476_v51 = vld [vmem:[%s6044_s9 + $0x4c] sm:$0xf]  ;;  %v3920_v15 = vld [vmem:[%s6044_s9 + $0xc0] sm:$0xf] }
  0x94   : > { %1577 = vmatprep.mubr.bf16.mxu0 %v1177_v62  ;;  %2011 = vmatprep.mubr.bf16.mxu1 %v3980_v32  ;;  %v267_v62 = vld [vmem:[%s6044_s9 + $0x84] sm:$0xf]  ;;  %v6471_v32 = vld [vmem:[%s6044_s9 + $0x40] sm:$0xf]  ;;  %v4136_v46 = vcombine.low %v4040_v36, %v6476_v51 }
  0x95   : > { %v1070_v7 = vrot.slane %v4132_v4, 1  ;;  %v3967_v44 = vcombine.low %v267_v62, %v6375_v56  ;;  %v4134_v40 = vcombine.low %v4038_v30, %v6471_v32  ;;  %v269_v56 = vld [vmem:[%s6044_s9 + $0x90] sm:$0xf]  ;;  %v5613_v4 = vld [vmem:[%s7236_s1 + $0x1d8] sm:$0xff]   ;;  %v4050_v36 = vld [vmem:[%s6044_s9 + $0x84] sm:$0xe] }
  0x96   : > { %v1088_v22 = vrot.slane %v4136_v46, 1  ;;  %v3968_v43 = vcombine.low %v269_v56, %v6389_v5  ;;  %v4140_v5 = vcombine.low %v4044_v54, %v6494_v59  ;;  %v5614_v62 = vld [vmem:[%s7236_s1 + $0x198] sm:$0xff]   ;;  %v3970_v46 = vcombine.low %v273_v45, %v6434_v52  ;;  %v5638_v52 = vld [vmem:[%s6044_s9 + $0x20] ss:$0 sps:$4 sm:$0x33]  }
  0x97   : > { %v1072_v42 = vsel %vm1063_vm0, %v1070_v7, %v1071_v19  ;;  %v5621_v7 = vld [vmem:[%s7236_s1 + $0x1e0] sm:$0xff]   ;;  %v2626_v60 = vrot.slane %v5638_v52, 2  ;;  %v5760_v45 = vld [vmem:[%s6044_s9 + $0x34] sm:$0xf] }
  0x98   : > { %v1106_v12 = vrot.slane %v4140_v5, 1 }
  0x9a   : > { %v1108_v28 = vsel %vm1063_vm0, %v1106_v12, %v1107_v14 }
  0x9b   : > { %1578 = vmatmul.mubr.bf16.gmra.mrb[48].mxu0 %v1174_v47  ;;  %2012 = vmatmul.mubr.bf16.gmra.mrb[48].mxu1 %v3964_v48  ;;  %v5606_v47 = vld [vmem:[%s6044_s9 + $0x50] ss:$0 sps:$4 sm:$0x11]   ;;  %v1079_v48 = vrot.slane %v4134_v40, 1  ;;  %v3922_v40 = vld [vmem:[%s6044_s9 + $0xcc] sm:$0xf] }
  0x9c   : > { %1585 = vmatprep.mubr.bf16.mxu0 %v1186_v49  ;;  %2019 = vmatprep.mubr.bf16.mxu1 %v3981_v50  ;;  %v1080_v49 = vrot.slane %v5598_v41, 1  ;;  %v6489_v50 = vld [vmem:[%s6044_s9 + $0x58] sm:$0xf]  ;;  %v1089_v61 = vrot.slane %v5606_v47, 1  ;;  %v5622_v41 = vld [vmem:[%s7236_s1 + $0x1a0] sm:$0xff]  }
  0x9d   : > { %v4138_v0 = vcombine.low %v4042_v10, %v6489_v50  ;;  %v3987_v10 = vcombine.low %v3922_v40, %v6438_v6  ;;  %v5632_v6 = vld [vmem:[%s7236_s1 + $0x1f0] sm:$0xff]  }
  0x9e   : > { %v1081_v57 = vsel %vm1063_vm0, %v1079_v48, %v1080_v49  ;;  %v4260_v48 = vld [vmem:[%s6044_s9 + $0x18] sm:$0xc]  ;;  %v5624_v49 = vld [vmem:[%s7236_s1 + $0x1e8] sm:$0xff]  }
  0x9f   : > { %v1097_v8 = vrot.slane %v4138_v0, 1  ;;  %v3924_v0 = vld [vmem:[%s6044_s9 + $0x30] sm:$0xf] }
  0xa1   : > { %v1099_v20 = vsel %vm1063_vm0, %v1097_v8, %v1098_v55  ;;  %v5634_v55 = vld [vmem:[%s7236_s1 + $0x1f8] sm:$0xff]  }
  0xa3   : > { %1586 = vmatmul.mubr.bf16.gmra.mrb[52].mxu0 %v1183_v13  ;;  %2020 = vmatmul.mubr.bf16.gmra.mrb[52].mxu1 %v3965_v1  ;;  %v1090_v13 = vsel %vm1063_vm0, %v1088_v22, %v1089_v61  ;;  %v3985_v1 = vcombine.low %v3918_v53, %v6398_v29  ;;  %v6519_v29 = vld [vmem:[%s6044_s9 + $0x70] sm:$0xf]  ;;  %v5756_v22 = vld [vmem:[%s6044_s9 + $0x1c] sm:$0xf]  ;;  %v5625_v53 = vld [vmem:[%s7236_s1 + $0x1a8] sm:$0xff]  }
  0xa4   : > { %1593 = vmatprep.mubr.bf16.mxu0 %v1195_v2  ;;  %2027 = vmatprep.mubr.bf16.mxu1 %v3982_v3  ;;  %v5604_v2 = vld [vmem:[%s7236_s1 + $0x188] sm:$0xff]   ;;  %v5611_v3 = vld [vmem:[%s7236_s1 + $0x1d0] sm:$0xff]   ;;  %v4356_v61 = vcombine.low %v4260_v48, %v5756_v22  ;;  %v2241_v48 = vld [vmem:[%s6044_s9 + $0x18] sm:$0xc] }
  0xab   : > { %1594 = vmatmul.mubr.bf16.gmra.mrb[56].mxu0 %v1192_v21  ;;  %2028 = vmatmul.mubr.bf16.gmra.mrb[56].mxu1 %v3966_v38  ;;  %v3969_v21 = vcombine.low %v271_v11, %v6410_v33  ;;  %v5612_v38 = vld [vmem:[%s7236_s1 + $0x190] sm:$0xff]   ;;  %v3986_v33 = vcombine.low %v3920_v15, %v6414_v35  ;;  %v6549_v35 = vld [vmem:[%s6044_s9 + $0x88] sm:$0xf]  ;;  %v3988_v11 = vcombine.low %v3924_v0, %v6460_v18  ;;  %v5635_v15 = vld [vmem:[%s7236_s1 + $0x1b8] sm:$0xff]  }
  0xac   : > { %1601 = vmatprep.mubr.bf16.mxu0 %v1204_v23  ;;  %2035 = vmatprep.mubr.bf16.mxu1 %v3983_v26  ;;  %v4142_v23 = vcombine.low %v4046_v17, %v6519_v29  ;;  %v5619_v26 = vld [vmem:[%s6044_s9 + $0x74] ss:$0 sps:$4 sm:$0x11]   ;;  %v4146_v47 = vcombine.low %v4050_v36, %v6549_v35  ;;  %v5758_v17 = vld [vmem:[%s6044_s9 + $0x28] sm:$0xf] }
  0xad   : > { %v1116_v30 = vrot.slane %v5619_v26, 1  ;;  %v4358_v12 = vcombine.low %v4262_v58, %v5758_v17  ;;  %v2239_v26 = vld [vmem:[%s6044_s9 + $0xc] sm:$0xc] }
  0xae   : > { %v1115_v19 = vrot.slane %v4142_v23, 1  ;;  %v1133_v54 = vrot.slane %v4146_v47, 1  ;;  %v3934_v0 = vld [vmem:[%s6044_s9 + $0x6c] sm:$0xf] }
  0xb3   : > { %1602 = vmatmul.mubr.bf16.gmra.mrb[60].mxu0 %v1201_v39  ;;  %2036 = vmatmul.mubr.bf16.gmra.mrb[60].mxu1 %v3967_v44  ;;  %v1124_v39 = vrot.slane %v4144_v31, 1  ;;  %v1125_v44 = vrot.slane %v5627_v27, 1  ;;  %v4264_v27 = vld [vmem:[%s6044_s9 + $0x30] sm:$0xc] }
  0xb4   : > { %5082 = vmatprep.mubr.bf16.mxu0 %v1072_v42  ;;  %2043 = vmatprep.mubr.bf16.mxu1 %v3984_v24  ;;  %v5630_v42 = vld [vmem:[%s6044_s9 + $0x8c] ss:$0 sps:$4 sm:$0x11]   ;;  %v1117_v24 = vsel %vm1063_vm0, %v1115_v19, %v1116_v30  ;;  %v5759_v31 = vld [vmem:[%s6044_s9 + $0x10] sm:$0xf]  ;;  %v4360_v36 = vcombine.low %v4264_v27, %v5760_v45 }
  0xb5   : > { %v1126_v56 = vsel %vm1063_vm0, %v1124_v39, %v1125_v44  ;;  %v5652_v39 = vld [vmem:[%s6044_s9 + $0x38] ss:$0 sps:$4 sm:$0x33]   ;;  %v5649_v44 = vld [vmem:[%s7236_s1 + $0x208] sm:$0xff]  }
  0xb6   : > { %v2644_v47 = vrot.slane %v5652_v39, 2  ;;  %v6659_v39 = vld [vmem:[%s6044_s9 + $0x94] sm:$0xf] }
  0xbb   : > { %5083 = vmatmul.mubr.bf16.vlgmr.msra.gmra.mrb[64].mxu0 %v1081_v57  ;;  %2044 = vmatmul.mubr.bf16.gmra.mrb[64].mxu1 %v3968_v43  ;;  %v1134_v57 = vrot.slane %v5630_v42, 1  ;;  %v275_v43 = vld [vmem:[%s6044_s9 + $0xb4] sm:$0xf] }
  0xbc   : > { %4931 = vmatpush3.bf16.msra.mxu0 %v5601_v63  ;;  %5086 = vmatprep.mubr.bf16.mxu0 %v1090_v13  ;;  %v2237_v63 = vld [vmem:[%s6044_s9] sm:$0xc]  ;;  %v5641_v13 = vld [vmem:[%s6044_s9 + $0x8] ss:$0 sps:$4 sm:$0x33]   ;;  %v3971_v5 = vcombine.low %v275_v43, %v6452_v9  ;;  %v5656_v42 = vld [vmem:[%s7236_s1 + $0x210] sm:$0xff]  }
  0xbd   : > { %4932 = vmatprep.subr.bf16.mxu0 %v5603_v34  ;;  %2051 = vmatprep.mubr.bf16.mxu1 %v3985_v1  ;;  %v2625_v34 = vrot.slane %v4356_v61, 2  ;;  %v1135_v1 = vsel %vm1063_vm0, %v1133_v54, %v1134_v57  ;;  %v5645_v9 = vld [vmem:[%s6044_s9 + $0x2c] ss:$0 sps:$4 sm:$0x33]   ;;  %v5761_v61 = vld [vmem:[%s6044_s9 + $0x1c] sm:$0xf] }
  0xbe   : > { %v2635_v23 = vrot.slane %v5645_v9, 2  ;;  %v4328_v52 = vcombine.low %v2241_v48, %v5761_v61  ;;  %v5762_v57 = vld [vmem:[%s6044_s9 + $0x40] sm:$0xf]  ;;  %v3944_v61 = vld [vmem:[%s6044_s9 + $0xa8] sm:$0xf] }
  0xbf   : > { %v2627_v14 = vsel %vm2621_vm1, %v2625_v34, %v2626_v60  ;;  %v5670_v60 = vld [vmem:[%s7236_s1 + $0x220] sm:$0xff]  }
  0xc0   : > { %4933 = vmatpush3.bf16.msra.mxu0 %v5604_v2  ;;  %v5633_v2 = vld [vmem:[%s7236_s1 + $0x1b0] sm:$0xff]   ;;  %v2640_v58 = vrot.slane %v4328_v52, 2  ;;  %v4272_v52 = vld [vmem:[%s6044_s9 + $0x60] sm:$0xc] }
  0xc1   : > { %4934 = vmatprep.subr.bf16.mxu0 %v5611_v3  ;;  %v5757_v3 = vld [vmem:[%s6044_s9 + $0x4] sm:$0xf] }
  0xc2   : > { %v4324_v8 = vcombine.low %v2237_v63, %v5757_v3  ;;  %v5663_v63 = vld [vmem:[%s7236_s1 + $0x218] sm:$0xff]   ;;  %v4268_v3 = vld [vmem:[%s6044_s9 + $0x48] sm:$0xc] }
  0xc3   : > { %5087 = vmatmul.mubr.bf16.gmra.mrb[68].mxu0 %v1099_v20  ;;  %2052 = vmatmul.mubr.bf16.gmra.mrb[68].mxu1 %v3969_v21  ;;  %v2623_v20 = vrot.slane %v5641_v13, 2  ;;  %v3926_v21 = vld [vmem:[%s6044_s9 + $0x3c] sm:$0xf] }
  0xc4   : > { %4935 = vmatpush3.bf16.msra.mxu0 %v5612_v38  ;;  %5090 = vmatprep.mubr.bf16.mxu0 %v1108_v28  ;;  %v2622_v25 = vrot.slane %v4324_v8, 2  ;;  %v2634_v38 = vrot.slane %v4358_v12, 2  ;;  %v3989_v28 = vcombine.low %v3926_v21, %v6471_v32  ;;  %v3993_v8 = vcombine.low %v3934_v0, %v6519_v29  ;;  %v5662_v12 = vld [vmem:[%s6044_s9 + $0x2c] ss:$0 sps:$4 sm:$0x33]  }
  0xc5   : > { %4936 = vmatprep.subr.bf16.mxu0 %v5613_v4  ;;  %2059 = vmatprep.mubr.bf16.mxu1 %v3986_v33  ;;  %v3928_v4 = vld [vmem:[%s6044_s9 + $0x48] sm:$0xf] }
  0xc6   : > { %v2624_v33 = vsel %vm2621_vm1, %v2622_v25, %v2623_v20  ;;  %v3990_v19 = vcombine.low %v3928_v4, %v6476_v51  ;;  %v2636_v30 = vsel %vm2621_vm1, %v2634_v38, %v2635_v23  ;;  %v5666_v20 = vld [vmem:[%s6044_s9 + $0x50] ss:$0 sps:$4 sm:$0x33]   ;;  %v5677_v21 = vld [vmem:[%s7236_s1 + $0x228] sm:$0xff]   ;;  %v3938_v38 = vld [vmem:[%s6044_s9 + $0x84] sm:$0xf] }
  0xc7   : > { %v2662_v27 = vrot.slane %v5666_v20, 2  ;;  %v5683_v20 = vld [vmem:[%s6044_s9 + $0x50] ss:$0 sps:$4 sm:$0x33]  }
  0xc8   : > { %4937 = vmatpush3.bf16.msra.mxu0 %v5614_v62  ;;  %v4326_v62 = vcombine.low %v2239_v26, %v5759_v31  ;;  %v2650_v26 = vrot.slane %v5662_v12, 2  ;;  %v4270_v31 = vld [vmem:[%s6044_s9 + $0x54] sm:$0xc]  ;;  %v6691_v12 = vld [vmem:[%s6044_s9 + $0xb8] sm:$0xf] }
  0xc9   : > { %4938 = vmatprep.subr.bf16.mxu0 %v5621_v7  ;;  %v5648_v7 = vld [vmem:[%s6044_s9 + $0x14] ss:$0 sps:$4 sm:$0x33]  }
  0xca   : > { %v2631_v40 = vrot.slane %v4326_v62, 2  ;;  %v5684_v62 = vld [vmem:[%s7236_s1 + $0x230] sm:$0xff]  }
  0xcb   : > { %5091 = vmatmul.mubr.bf16.gmra.mrb[72].mxu0 %v1117_v24  ;;  %2060 = vmatmul.mubr.bf16.gmra.mrb[72].mxu1 %v3970_v46  ;;  %v3930_v24 = vld [vmem:[%s6044_s9 + $0x54] sm:$0xf]  ;;  %v2643_v46 = vrot.slane %v4360_v36, 2  ;;  %v5669_v36 = vld [vmem:[%s6044_s9 + $0x38] ss:$0 sps:$4 sm:$0x33]  }
  0xcc   : > { %4939 = vmatpush3.bf16.msra.mxu0 %v5622_v41  ;;  %5094 = vmatprep.mubr.bf16.mxu0 %v1126_v56  ;;  %v2632_v41 = vrot.slane %v5648_v7, 2  ;;  %v4266_v56 = vld [vmem:[%s6044_s9 + $0x3c] sm:$0xc]  ;;  %v3995_v7 = vcombine.low %v3938_v38, %v6549_v35 }
  0xcd   : > { %4940 = vmatprep.subr.bf16.mxu0 %v5624_v49  ;;  %2067 = vmatprep.mubr.bf16.mxu1 %v3987_v10  ;;  %v3932_v49 = vld [vmem:[%s6044_s9 + $0x60] sm:$0xf]  ;;  %v3991_v10 = vcombine.low %v3930_v24, %v6489_v50  ;;  %v2645_v54 = vsel %vm2621_vm1, %v2643_v46, %v2644_v47  ;;  %v4362_v43 = vcombine.low %v4266_v56, %v5762_v57  ;;  %v5673_v24 = vld [vmem:[%s6044_s9 + $0x5c] ss:$0 sps:$4 sm:$0x33]  }
  0xce   : > { %v2633_v22 = vsel %vm2621_vm1, %v2631_v40, %v2632_v41  ;;  %v5767_v41 = vld [vmem:[%s6044_s9 + $0x58] sm:$0xf]  ;;  %v3942_v47 = vld [vmem:[%s6044_s9 + $0x9c] sm:$0xf]  ;;  %v5769_v57 = vld [vmem:[%s6044_s9 + $0x40] sm:$0xf] }
  0xcf   : > { %v2652_v13 = vrot.slane %v4362_v43, 2  ;;  %v5691_v46 = vld [vmem:[%s7236_s1 + $0x238] sm:$0xff]  }
  0xd0   : > { %4941 = vmatpush3.bf16.msra.mxu0 %v5625_v53  ;;  %v5655_v53 = vld [vmem:[%s6044_s9 + $0x20] ss:$0 sps:$4 sm:$0x33]  }
  0xd1   : > { %4942 = vmatprep.subr.bf16.mxu0 %v5632_v6  ;;  %v5659_v6 = vld [vmem:[%s6044_s9 + $0x44] ss:$0 sps:$4 sm:$0x33]   ;;  %v2641_v34 = vrot.slane %v5655_v53, 2  ;;  %v6673_v53 = vld [vmem:[%s6044_s9 + $0xa0] sm:$0xf] }
  0xd3   : > { %5095 = vmatmul.mubr.bf16.gmra.mrb[76].mxu0 %v1135_v1  ;;  %2068 = vmatmul.mubr.bf16.gmra.mrb[76].mxu1 %v3971_v5  ;;  %v2653_v1 = vrot.slane %v5659_v6, 2  ;;  %v2243_v5 = vld [vmem:[%s6044_s9 + $0x24] sm:$0xc]  ;;  %v5676_v6 = vld [vmem:[%s6044_s9 + $0x44] ss:$0 sps:$4 sm:$0x33]  }
  0xd4   : > { %4943 = vmatpush3.bf16.msra.mxu0 %v5633_v2  ;;  %5130 = vmatprep.mubr.bf16.mxu1 %v3988_v11  ;;  %v3936_v2 = vld [vmem:[%s6044_s9 + $0x78] sm:$0xf]  ;;  %v5763_v11 = vld [vmem:[%s6044_s9 + $0x28] sm:$0xf] }
  0xd5   : > { %4944 = vmatprep.subr.bf16.mxu0 %v5634_v55  ;;  %3039 = vmatprep.mubr.bf16.mxu0 %v2627_v14  ;;  %v2642_v55 = vsel %vm2621_vm1, %v2640_v58, %v2641_v34  ;;  %v4330_v17 = vcombine.low %v2243_v5, %v5763_v11  ;;  %v3994_v9 = vcombine.low %v3936_v2, %v6524_v16  ;;  %v5771_v34 = vld [vmem:[%s6044_s9 + $0x64] sm:$0xf]  ;;  %v2668_v5 = vrot.slane %v5676_v6, 2  ;;  %v3946_v2 = vld [vmem:[%s6044_s9 + $0xb4] sm:$0xf] }
  0xd6   : > { %v2654_v14 = vsel %vm2621_vm1, %v2652_v13, %v2653_v1  ;;  %v5680_v13 = vld [vmem:[%s6044_s9 + $0x68] ss:$0 sps:$4 sm:$0x33]   ;;  %v3948_v11 = vld [vmem:[%s6044_s9 + $0xc0] sm:$0xf] }
  0xd7   : > { %v2649_v23 = vrot.slane %v4330_v17, 2  ;;  %v4274_v17 = vld [vmem:[%s6044_s9 + $0x6c] sm:$0xc] }
  0xd8   : > { %4945 = vmatpush3.bf16.msra.mxu0 %v5635_v15  ;;  %v5764_v15 = vld [vmem:[%s6044_s9 + $0x4c] sm:$0xf] }
  0xd9   : > { %v4364_v25 = vcombine.low %v4268_v3, %v5764_v15  ;;  %v5773_v15 = vld [vmem:[%s6044_s9 + $0x4c] sm:$0xf] }
  0xdb   : > { %3040 = vmatmul.mubr.bf16.vlgmr.msra.gmra.mrb[80].mxu0 %v2624_v33  ;;  %5131 = vmatmul.mubr.bf16.vlgmr.msra.gmra.mrb[80].mxu1 %v3989_v28  ;;  %v2661_v4 = vrot.slane %v4364_v25, 2  ;;  %v2245_v28 = vld [vmem:[%s6044_s9 + $0x30] sm:$0xc] }
  0xdc   : > { %3047 = vmatprep.mubr.bf16.mxu0 %v2636_v30  ;;  %5163 = vmatpush3.bf16.msra.mxu1 %v6420_v37  ;;  %v3992_v37 = vcombine.low %v3932_v49, %v6494_v59  ;;  %v3940_v33 = vld [vmem:[%s6044_s9 + $0x90] sm:$0xf]  ;;  %v5765_v30 = vld [vmem:[%s6044_s9 + $0x34] sm:$0xf]  ;;  %v2659_v49 = vrot.slane %v5669_v36, 2 }
  0xdd   : > { %5134 = vmatprep.mubr.bf16.mxu1 %v3990_v19  ;;  %5164 = vmatprep.subr.bf16.mxu1 %v5649_v44  ;;  %v2651_v19 = vsel %vm2621_vm1, %v2649_v23, %v2650_v26  ;;  %v4332_v45 = vcombine.low %v2245_v28, %v5765_v30  ;;  %v2663_v40 = vsel %vm2621_vm1, %v2661_v4, %v2662_v27  ;;  %v5775_v26 = vld [vmem:[%s6044_s9 + $0x70] sm:$0xf]  ;;  %v5687_v27 = vld [vmem:[%s6044_s9 + $0x74] ss:$0 sps:$4 sm:$0x33]  }
  0xde   : > { %v4370_v4 = vcombine.low %v4274_v17, %v5775_v26  ;;  %v3950_v28 = vld [vmem:[%s6044_s9 + $0xcc] sm:$0xf]  ;;  %v2251_v30 = vld [vmem:[%s6044_s9 + $0x54] sm:$0xc]  ;;  %v4276_v36 = vld [vmem:[%s6044_s9 + $0x78] sm:$0xc] }
  0xdf   : > { %v2658_v48 = vrot.slane %v4332_v45, 2  ;;  %v5697_v17 = vld [vmem:[%s6044_s9 + $0x68] ss:$0 sps:$4 sm:$0x33]  }
  0xe0   : > { %5165 = vmatpush3.bf16.msra.mxu1 %v5649_v44  ;;  %v3996_v44 = vcombine.low %v3940_v33, %v6659_v39 }
  0xe1   : > { %5166 = vmatprep.subr.bf16.mxu1 %v5656_v42 }
  0xe3   : > { %3048 = vmatmul.mubr.bf16.gmra.mrb[84].mxu0 %v2633_v22  ;;  %5135 = vmatmul.mubr.bf16.gmra.mrb[84].mxu1 %v3991_v10  ;;  %v2671_v10 = vrot.slane %v5673_v24, 2  ;;  %v2247_v22 = vld [vmem:[%s6044_s9 + $0x3c] sm:$0xc] }
  0xe4   : > { %3055 = vmatprep.mubr.bf16.mxu0 %v2645_v54  ;;  %5138 = vmatprep.mubr.bf16.mxu1 %v3992_v37  ;;  %v3997_v37 = vcombine.low %v3942_v47, %v6673_v53  ;;  %v2660_v54 = vsel %vm2621_vm1, %v2658_v48, %v2659_v49  ;;  %v4334_v43 = vcombine.low %v2247_v22, %v5769_v57  ;;  %v5777_v48 = vld [vmem:[%s6044_s9 + $0x58] sm:$0xf]  ;;  %v6719_v22 = vld [vmem:[%s6044_s9 + $0xdc] sm:$0xf] }
  0xe5   : > { %5167 = vmatpush3.bf16.msra.mxu1 %v5656_v42  ;;  %v4366_v42 = vcombine.low %v4270_v31, %v5767_v41  ;;  %v2677_v31 = vrot.slane %v5683_v20, 2  ;;  %v6710_v41 = vld [vmem:[%s6044_s9 + $0xd0] sm:$0xf]  ;;  %v4338_v49 = vcombine.low %v2251_v30, %v5777_v48  ;;  %v5693_v57 = vld [vmem:[%s6044_s9 + $0x80] ss:$0 sps:$4 sm:$0x33]  }
  0xe6   : > { %5168 = vmatprep.subr.bf16.mxu1 %v5663_v63  ;;  %v2667_v1 = vrot.slane %v4334_v43, 2  ;;  %v5703_v30 = vld [vmem:[%s6044_s9 + $0x50] ss:$0 sps:$4 sm:$0x33]   ;;  %v4298_v48 = vld [vmem:[%s6044_s9 + $0x54] sm:$0xc] }
  0xe7   : > { %v2670_v56 = vrot.slane %v4366_v42, 2  ;;  %v4001_v42 = vcombine.low %v3950_v28, %v6710_v41 }
  0xe9   : > { %5169 = vmatpush3.bf16.msra.mxu1 %v5663_v63  ;;  %v6680_v63 = vld [vmem:[%s6044_s9 + $0xac] sm:$0xf]  ;;  %v2672_v58 = vsel %vm2621_vm1, %v2670_v56, %v2671_v10  ;;  %v5690_v56 = vld [vmem:[%s6044_s9 + $0x5c] ss:$0 sps:$4 sm:$0x33]  }
  0xea   : > { %5170 = vmatprep.subr.bf16.mxu1 %v5670_v60  ;;  %v3998_v0 = vcombine.low %v3944_v61, %v6680_v63 }
  0xeb   : > { %3056 = vmatmul.mubr.bf16.gmra.mrb[88].mxu0 %v2642_v55  ;;  %5139 = vmatmul.mubr.bf16.gmra.mrb[88].mxu1 %v3993_v8  ;;  %v2680_v8 = vrot.slane %v5680_v13, 2  ;;  %v2249_v55 = vld [vmem:[%s6044_s9 + $0x48] sm:$0xc]  ;;  %v3954_v13 = vld [vmem:[%s6044_s9 + $0xe4] sm:$0xf] }
  0xec   : > { %3063 = vmatprep.mubr.bf16.mxu0 %v2654_v14  ;;  %5142 = vmatprep.mubr.bf16.mxu1 %v3994_v9  ;;  %v3999_v9 = vcombine.low %v3946_v2, %v6691_v12  ;;  %v2669_v14 = vsel %vm2621_vm1, %v2667_v1, %v2668_v5  ;;  %v4336_v25 = vcombine.low %v2249_v55, %v5773_v15  ;;  %v2698_v5 = vrot.slane %v5693_v57, 2  ;;  %v4294_v2 = vld [vmem:[%s6044_s9 + $0x3c] sm:$0xc]  ;;  %v5780_v55 = vld [vmem:[%s6044_s9 + $0x64] sm:$0xf] }
  0xed   : > { %5171 = vmatpush3.bf16.msra.mxu1 %v5670_v60  ;;  %v4368_v60 = vcombine.low %v4272_v52, %v5771_v34  ;;  %v2686_v34 = vrot.slane %v5690_v56, 2  ;;  %v5705_v57 = vld [vmem:[%s6044_s9 + $0x74] ss:$0 sps:$4 sm:$0x33]  }
  0xee   : > { %5172 = vmatprep.subr.bf16.mxu1 %v5677_v21  ;;  %v2676_v33 = vrot.slane %v4336_v25, 2 }
  0xef   : > { %v2679_v3 = vrot.slane %v4368_v60, 2  ;;  %v2253_v60 = vld [vmem:[%s6044_s9 + $0x60] sm:$0xc] }
  0xf0   : > { %v2678_v24 = vsel %vm2621_vm1, %v2676_v33, %v2677_v31  ;;  %v5701_v33 = vld [vmem:[%s6044_s9 + $0x8c] ss:$0 sps:$4 sm:$0x33]  }
  0xf1   : > { %5173 = vmatpush3.bf16.msra.mxu1 %v5677_v21  ;;  %v6698_v21 = vld [vmem:[%s6044_s9 + $0xc4] sm:$0xf]  ;;  %v2681_v23 = vsel %vm2621_vm1, %v2679_v3, %v2680_v8 }
  0xf2   : > { %5174 = vmatprep.subr.bf16.mxu1 %v5684_v62  ;;  %v4000_v38 = vcombine.low %v3948_v11, %v6698_v21  ;;  %v4278_v8 = vld [vmem:[%s6044_s9 + $0x84] sm:$0xc]  ;;  %v4340_v11 = vcombine.low %v2253_v60, %v5780_v55  ;;  %v2704_v55 = vrot.slane %v5705_v57, 2 }
  0xf3   : > { %3064 = vmatmul.mubr.bf16.gmra.mrb[92].mxu0 %v2651_v19  ;;  %5143 = vmatmul.mubr.bf16.gmra.mrb[92].mxu1 %v3995_v7  ;;  %v2688_v7 = vrot.slane %v4370_v4, 2  ;;  %v2689_v19 = vrot.slane %v5687_v27, 2  ;;  %v5782_v27 = vld [vmem:[%s6044_s9 + $0x88] sm:$0xf] }
  0xf4   : > { %3071 = vmatprep.mubr.bf16.mxu0 %v2663_v40  ;;  %5146 = vmatprep.mubr.bf16.mxu1 %v3996_v44  ;;  %v4292_v40 = vld [vmem:[%s6044_s9 + $0x30] sm:$0xc]  ;;  %v4374_v28 = vcombine.low %v4278_v8, %v5782_v27  ;;  %v4282_v27 = vld [vmem:[%s6044_s9 + $0x9c] sm:$0xc] }
  0xf5   : > { %5175 = vmatpush3.bf16.msra.mxu1 %v5684_v62  ;;  %v3952_v62 = vld [vmem:[%s6044_s9 + $0xd8] sm:$0xf]  ;;  %v2690_v52 = vsel %vm2621_vm1, %v2688_v7, %v2689_v19  ;;  %v4388_v6 = vcombine.low %v4292_v40, %v6460_v18 }
  0xf6   : > { %5176 = vmatprep.subr.bf16.mxu1 %v5691_v46  ;;  %v4002_v61 = vcombine.low %v3952_v62, %v6719_v22 }
  0xf7   : > { %v2628_v3 = vrot.slane %v4388_v6, 2  ;;  %v4394_v6 = vcombine.low %v4298_v48, %v6489_v50 }
  0xf9   : > { %5177 = vmatpush3.bf16.msra.mxu1 %v5691_v46 }
  0xfb   : > { %3072 = vmatmul.mubr.bf16.gmra.mrb[96].mxu0 %v2660_v54  ;;  %5147 = vmatmul.mubr.bf16.gmra.mrb[0].mxu1 %v3997_v37  ;;  %v5779_v37 = vld [vmem:[%s6044_s9 + $0x7c] sm:$0xf] }
  0xfc   : > { %3079 = vmatprep.mubr.bf16.mxu0 %v2672_v58  ;;  %5150 = vmatprep.mubr.bf16.mxu1 %v3998_v0  ;;  %v4372_v54 = vcombine.low %v4276_v36, %v5779_v37  ;;  %v5695_v0 = vld [vmem:[%s6044_s9 + $0x38] ss:$0 sps:$4 sm:$0x33]   ;;  %v2685_v58 = vrot.slane %v4338_v49, 2  ;;  %v4280_v49 = vld [vmem:[%s6044_s9 + $0x90] sm:$0xc] }
  0xfd   : > { %v2629_v18 = vrot.slane %v5695_v0, 2  ;;  %v4300_v37 = vld [vmem:[%s6044_s9 + $0x60] sm:$0xc]  ;;  %v5707_v0 = vld [vmem:[%s6044_s9 + $0x5c] ss:$0 sps:$4 sm:$0x33]  }
  0xfe   : > { %v2697_v1 = vrot.slane %v4372_v54, 2  ;;  %v2687_v25 = vsel %vm2621_vm1, %v2685_v58, %v2686_v34  ;;  %v5784_v58 = vld [vmem:[%s6044_s9 + $0x94] sm:$0xf] }
  0xff   : > { %v2630_v7 = vsel %vm2621_vm1, %v2628_v3, %v2629_v18  ;;  %v4376_v34 = vcombine.low %v4280_v49, %v5784_v58  ;;  %v5711_v3 = vld [vmem:[%s6044_s9 + $0x68] ss:$0 sps:$4 sm:$0x33]   ;;  %v5719_v49 = vld [vmem:[%s6044_s9 + $0x80] ss:$0 sps:$4 sm:$0x33]  }
 0x100   : > { %v2699_v4 = vsel %vm2621_vm1, %v2697_v1, %v2698_v5  ;;  %v5709_v1 = vld [vmem:[%s6044_s9 + $0x98] ss:$0 sps:$4 sm:$0x33]   ;;  %v2683_v58 = vrot.slane %v5719_v49, 2 }
 0x103   : > { %3080 = vmatmul.mubr.bf16.gmra.mrb[100].mxu0 %v2669_v14  ;;  %5151 = vmatmul.mubr.bf16.gmra.mrb[4].mxu1 %v3999_v9  ;;  %v4296_v9 = vld [vmem:[%s6044_s9 + $0x48] sm:$0xc] }
 0x104   : > { %3087 = vmatprep.mubr.bf16.mxu0 %v2681_v23  ;;  %5154 = vmatprep.mubr.bf16.mxu1 %v4000_v38  ;;  %v6737_v14 = vld [vmem:[%s6044_s9 + $0xe8] sm:$0xf]  ;;  %v4390_v38 = vcombine.low %v4294_v2, %v6471_v32  ;;  %v5699_v23 = vld [vmem:[%s6044_s9 + $0x44] ss:$0 sps:$4 sm:$0x33]   ;;  %v4392_v19 = vcombine.low %v4296_v9, %v6476_v51  ;;  %v2706_v51 = vrot.slane %v4374_v28, 2  ;;  %v4396_v2 = vcombine.low %v4300_v37, %v6494_v59 }
 0x105   : > { %v4003_v15 = vcombine.low %v3954_v13, %v6737_v14  ;;  %v2715_v9 = vrot.slane %v4376_v34, 2  ;;  %v4284_v34 = vld [vmem:[%s6044_s9 + $0xa8] sm:$0xc] }
 0x106   : > { %v2637_v40 = vrot.slane %v4390_v38, 2  ;;  %v2646_v56 = vrot.slane %v4392_v19, 2  ;;  %v4302_v38 = vld [vmem:[%s6044_s9 + $0x6c] sm:$0xc] }
 0x10b   : > { %v4674_v45 = vpop.f32.mrb[0].mxu0  ;;  %3088 = vmatmul.mubr.bf16.gmra.mrb[104].mxu0 %v2678_v24  ;;  %5155 = vmatmul.mubr.bf16.gmra.mrb[8].mxu1 %v4001_v42  ;;  %v2638_v42 = vrot.slane %v5699_v23, 2  ;;  %v2255_v24 = vld [vmem:[%s6044_s9 + $0x6c] sm:$0xc] }
 0x10c   : > { %v4675_v44 = vpop.f32.mrb[1].mxu0  ;;  %3095 = vmatprep.mubr.bf16.mxu0 %v2690_v52  ;;  %5158 = vmatprep.mubr.bf16.mxu1 %v4002_v61  ;;  %v5783_v61 = vld [vmem:[%s6044_s9 + $0x70] sm:$0xf] }
 0x10d   : > { %v6714_v46 = vadd.f32 %v4675_v44, %v4674_v45  ;;  %v4677_v47 = vpop.f32.mrb[2].mxu0  ;;  %v2694_v45 = vrot.slane %v4340_v11, 2  ;;  %v2695_v44 = vrot.slane %v5697_v17, 2  ;;  %v4342_v52 = vcombine.low %v2255_v24, %v5783_v61  ;;  %v2259_v61 = vld [vmem:[%s6044_s9 + $0x84] sm:$0xc] }
 0x10e   : > { %v4678_v10 = vpop.f32.mrb[3].mxu0  ;;  %v2639_v60 = vsel %vm2621_vm1, %v2637_v40, %v2638_v42  ;;  %v2655_v11 = vrot.slane %v4394_v6, 2  ;;  %v2656_v17 = vrot.slane %v5707_v0, 2  ;;  %v5715_v40 = vld [vmem:[%s6044_s9 + $0x74] ss:$0 sps:$4 sm:$0x33]  }
 0x10f   : > { %v6725_v43 = vadd.f32 %v4678_v10, %v4677_v47  ;;  %v2707_v47 = vrot.slane %v5701_v33, 2  ;;  %v2647_v10 = vrot.slane %v5703_v30, 2  ;;  %v2696_v54 = vsel %vm2621_vm1, %v2694_v45, %v2695_v44  ;;  %v4304_v33 = vld [vmem:[%s6044_s9 + $0x78] sm:$0xc]  ;;  %v5786_v42 = vld [vmem:[%s6044_s9 + $0xa0] sm:$0xf] }
 0x110   : > { %v2703_v8 = vrot.slane %v4342_v52, 2  ;;  %v5713_v30 = vld [vmem:[%s6044_s9 + $0x80] ss:$0 sps:$4 sm:$0x33]   ;;  %v2657_v45 = vsel %vm2621_vm1, %v2655_v11, %v2656_v17  ;;  %v4378_v24 = vcombine.low %v4282_v27, %v5786_v42  ;;  %v4400_v48 = vcombine.low %v4304_v33, %v6524_v16  ;;  %v4306_v6 = vld [vmem:[%s6044_s9 + $0x84] sm:$0xc] }
 0x111   : > { %v2708_v13 = vsel %vm2621_vm1, %v2706_v51, %v2707_v47  ;;  %v2648_v5 = vsel %vm2621_vm1, %v2646_v56, %v2647_v10  ;;  %v5717_v51 = vld [vmem:[%s6044_s9 + $0xa4] ss:$0 sps:$4 sm:$0x33]   ;;  %v2713_v56 = vrot.slane %v5713_v30, 2  ;;  %v2674_v37 = vrot.slane %v5715_v40, 2 }
 0x112   : > { %v2725_v57 = vrot.slane %v5717_v51, 2  ;;  %v2682_v0 = vrot.slane %v4400_v48, 2  ;;  %v4310_v30 = vld [vmem:[%s6044_s9 + $0x9c] sm:$0xc]  ;;  %v4312_v40 = vld [vmem:[%s6044_s9 + $0xa8] sm:$0xc] }
 0x113   : > { %v4680_v20 = vpop.f32.mrb[4].mxu0  ;;  %3096 = vmatmul.mubr.bf16.gmra.mrb[108].mxu0 %v2687_v25  ;;  %5159 = vmatmul.mubr.bf16.gmra.mrb[12].mxu1 %v4003_v15  ;;  %v2716_v25 = vrot.slane %v5709_v1, 2  ;;  %v5721_v1 = vld [vmem:[%s6044_s9 + $0x8c] ss:$0 sps:$4 sm:$0x33]  }
 0x114   : > { %v4681_v26 = vpop.f32.mrb[5].mxu0  ;;  %3103 = vmatprep.mubr.bf16.mxu0 %v2699_v4  ;;  %5178 = vmatprep.mubr.bf16.mxu1 %v2630_v7  ;;  %v2665_v4 = vrot.slane %v5711_v3, 2  ;;  %v5785_v7 = vld [vmem:[%s6044_s9 + $0x7c] sm:$0xf]  ;;  %v5789_v51 = vld [vmem:[%s6044_s9 + $0x94] sm:$0xf] }
 0x115   : > { %v6746_v31 = vadd.f32 %v4681_v26, %v4680_v20  ;;  %v4683_v62 = vpop.f32.mrb[6].mxu0  ;;  %v2257_v20 = vld [vmem:[%s6044_s9 + $0x78] sm:$0xc]  ;;  %v2664_v26 = vrot.slane %v4396_v2, 2  ;;  %v2717_v44 = vsel %vm2621_vm1, %v2715_v9, %v2716_v25 }
 0x116   : > { %v4684_v32 = vpop.f32.mrb[7].mxu0  ;;  %v4344_v19 = vcombine.low %v2257_v20, %v5785_v7  ;;  %v5725_v20 = vld [vmem:[%s6044_s9 + $0xb0] ss:$0 sps:$4 sm:$0x33]  }
 0x117   : > { %v6751_v36 = vadd.f32 %v4684_v32, %v4683_v62  ;;  %v2705_v62 = vsel %vm2621_vm1, %v2703_v8, %v2704_v55  ;;  %v4398_v32 = vcombine.low %v4302_v38, %v6519_v29  ;;  %v2666_v47 = vsel %vm2621_vm1, %v2664_v26, %v2665_v4  ;;  %v5723_v55 = vld [vmem:[%s6044_s9 + $0x8c] ss:$0 sps:$4 sm:$0x33]   ;;  %v5727_v26 = vld [vmem:[%s6044_s9 + $0x98] ss:$0 sps:$4 sm:$0x33]  }
 0x118   : > { %v2712_v29 = vrot.slane %v4344_v19, 2  ;;  %v2684_v38 = vsel %vm2621_vm1, %v2682_v0, %v2683_v58  ;;  %v2722_v4 = vrot.slane %v5721_v1, 2  ;;  %v2692_v33 = vrot.slane %v5723_v55, 2  ;;  %v5729_v48 = vld [vmem:[%s6044_s9 + $0x98] ss:$0 sps:$4 sm:$0x33]  }
 0x119   : > { %v2673_v10 = vrot.slane %v4398_v32, 2  ;;  %v2734_v19 = vrot.slane %v5725_v20, 2  ;;  %v4286_v32 = vld [vmem:[%s6044_s9 + $0xb4] sm:$0xc] }
 0x11a   : > { %v2714_v3 = vsel %vm2621_vm1, %v2712_v29, %v2713_v56 }
 0x11b   : > { %3104 = vmatmul.mubr.bf16.gmra.mrb[112].mxu0 %v2696_v54  ;;  %v4686_v18 = vpop.f32.mrb[8].mxu0  ;;  %5179 = vmatmul.mubr.bf16.vlgmr.msra.gmra.mrb[80].mxu1 %v2639_v60  ;;  %v2724_v54 = vrot.slane %v4378_v24, 2  ;;  %v2675_v17 = vsel %vm2621_vm1, %v2673_v10, %v2674_v37  ;;  %v5790_v37 = vld [vmem:[%s6044_s9 + $0xb8] sm:$0xf] }
 0x11c   : > { %v4687_v50 = vpop.f32.mrb[9].mxu0  ;;  %3111 = vmatprep.mubr.bf16.mxu0 %v2708_v13  ;;  %5182 = vmatprep.mubr.bf16.mxu1 %v2648_v5  ;;  %v4308_v5 = vld [vmem:[%s6044_s9 + $0x90] sm:$0xc] }
 0x11d   : > { %v6769_v15 = vadd.f32 %v4687_v50, %v4686_v18  ;;  %v4689_v59 = vpop.f32.mrb[10].mxu0  ;;  %v5787_v18 = vld [vmem:[%s6044_s9 + $0x88] sm:$0xf]  ;;  %v4402_v50 = vcombine.low %v4306_v6, %v6549_v35  ;;  %v2726_v9 = vsel %vm2621_vm1, %v2724_v54, %v2725_v57  ;;  %v4382_v54 = vcombine.low %v4286_v32, %v5790_v37  ;;  %v5791_v32 = vld [vmem:[%s6044_s9 + $0xa0] sm:$0xf] }
 0x11e   : > { %v4690_v23 = vpop.f32.mrb[11].mxu0  ;;  %v4346_v8 = vcombine.low %v2259_v61, %v5787_v18  ;;  %v4406_v61 = vcombine.low %v4310_v30, %v6673_v53  ;;  %v5743_v37 = vld [vmem:[%s6044_s9 + $0xc8] ss:$0 sps:$4 sm:$0x33]  }
 0x11f   : > { %v6774_v28 = vadd.f32 %v4690_v23, %v4689_v59  ;;  %v5788_v59 = vld [vmem:[%s6044_s9 + $0xac] sm:$0xf]  ;;  %v4404_v23 = vcombine.low %v4308_v5, %v6659_v39  ;;  %v2691_v27 = vrot.slane %v4402_v50, 2  ;;  %v2742_v55 = vrot.slane %v4382_v54, 2 }
 0x120   : > { %v4380_v25 = vcombine.low %v4284_v34, %v5788_v59  ;;  %v2721_v35 = vrot.slane %v4346_v8, 2  ;;  %v5733_v34 = vld [vmem:[%s6044_s9 + $0xbc] ss:$0 sps:$4 sm:$0x33]   ;;  %v2731_v8 = vrot.slane %v5729_v48, 2  ;;  %v2709_v50 = vrot.slane %v4406_v61, 2 }
 0x121   : > { %v2693_v0 = vsel %vm2621_vm1, %v2691_v27, %v2692_v33  ;;  %v2263_v59 = vld [vmem:[%s6044_s9 + $0x9c] sm:$0xc]  ;;  %v5737_v33 = vld [vmem:[%s6044_s9 + $0xa4] ss:$0 sps:$4 sm:$0x33]  }
 0x122   : > { %v2733_v7 = vrot.slane %v4380_v25, 2  ;;  %v2723_v10 = vsel %vm2621_vm1, %v2721_v35, %v2722_v4  ;;  %v4314_v25 = vld [vmem:[%s6044_s9 + $0xb4] sm:$0xc] }
 0x123   : > { %3112 = vmatmul.mubr.bf16.gmra.mrb[116].mxu0 %v2705_v62  ;;  %5183 = vmatmul.mubr.bf16.gmra.mrb[84].mxu1 %v2657_v45  ;;  %v2261_v62 = vld [vmem:[%s6044_s9 + $0x90] sm:$0xc]  ;;  %v2700_v45 = vrot.slane %v4404_v23, 2  ;;  %v4288_v23 = vld [vmem:[%s6044_s9 + $0xc0] sm:$0xc] }
 0x124   : > { %3119 = vmatprep.mubr.bf16.mxu0 %v2717_v44  ;;  %5186 = vmatprep.mubr.bf16.mxu1 %v2666_v47  ;;  %v2701_v44 = vrot.slane %v5727_v26, 2  ;;  %v4348_v47 = vcombine.low %v2261_v62, %v5789_v51  ;;  %v2735_v58 = vsel %vm2621_vm1, %v2733_v7, %v2734_v19  ;;  %v4316_v26 = vld [vmem:[%s6044_s9 + $0xc0] sm:$0xc] }
 0x126   : > { %v4692_v52 = vpop.f32.mrb[12].mxu0  ;;  %v2702_v53 = vsel %vm2621_vm1, %v2700_v45, %v2701_v44  ;;  %v2730_v18 = vrot.slane %v4348_v47, 2  ;;  %v4410_v45 = vcombine.low %v4314_v25, %v6691_v12  ;;  %v5739_v44 = vld [vmem:[%s6044_s9 + $0xbc] ss:$0 sps:$4 sm:$0x33]  }
 0x127   : > { %v4693_v16 = vpop.f32.mrb[13].mxu0  ;;  %v5792_v47 = vld [vmem:[%s6044_s9 + $0xc4] sm:$0xf] }
 0x128   : > { %v6792_v60 = vadd.f32 %v4693_v16, %v4692_v52  ;;  %v4695_v13 = vpop.f32.mrb[14].mxu0  ;;  %v5731_v52 = vld [vmem:[%s6044_s9 + $0xa4] ss:$0 sps:$4 sm:$0x33]   ;;  %v2732_v27 = vsel %vm2621_vm1, %v2730_v18, %v2731_v8  ;;  %v4384_v48 = vcombine.low %v4288_v23, %v5792_v47  ;;  %v4318_v18 = vld [vmem:[%s6044_s9 + $0xcc] sm:$0xc] }
 0x129   : > { %v4696_v2 = vpop.f32.mrb[15].mxu0  ;;  %v4290_v8 = vld [vmem:[%s6044_s9 + $0xcc] sm:$0xc] }
 0x12a   : > { %v6800_v11 = vadd.f32 %v4696_v2, %v4695_v13  ;;  %v4408_v13 = vcombine.low %v4312_v40, %v6680_v63  ;;  %v5735_v2 = vld [vmem:[%s6044_s9 + $0xb0] ss:$0 sps:$4 sm:$0x33]   ;;  %v2710_v63 = vrot.slane %v5731_v52, 2 }
 0x12b   : > { %3120 = vmatmul.mubr.bf16.gmra.mrb[120].mxu0 %v2714_v3  ;;  %5187 = vmatmul.mubr.bf16.gmra.mrb[88].mxu1 %v2675_v17  ;;  %v2743_v17 = vrot.slane %v5733_v34, 2 }
 0x12c   : > { %3127 = vmatprep.mubr.bf16.mxu0 %v2726_v9  ;;  %5190 = vmatprep.mubr.bf16.mxu1 %v2684_v38  ;;  %v2718_v9 = vrot.slane %v4408_v13, 2  ;;  %v2719_v38 = vrot.slane %v5735_v2, 2  ;;  %v2711_v30 = vsel %vm2621_vm1, %v2709_v50, %v2710_v63  ;;  %v2265_v13 = vld [vmem:[%s6044_s9 + $0xa8] sm:$0xc] }
 0x12d   : > { %v2744_v51 = vsel %vm2621_vm1, %v2742_v55, %v2743_v17  ;;  %v5745_v2 = vld [vmem:[%s6044_s9 + $0xb0] ss:$0 sps:$4 sm:$0x33]   ;;  %v4320_v55 = vld [vmem:[%s6044_s9 + $0xd8] sm:$0xc] }
 0x12e   : > { %v4698_v39 = vpop.f32.mrb[16].mxu0  ;;  %v4810_v24 = vpop.f32.mrb[16].mxu1  ;;  %v2720_v52 = vsel %vm2621_vm1, %v2718_v9, %v2719_v38  ;;  %v5793_v38 = vld [vmem:[%s6044_s9 + $0xac] sm:$0xf] }
 0x12f   : > { %v4699_v42 = vpop.f32.mrb[17].mxu0  ;;  %v4811_v56 = vpop.f32.mrb[17].mxu1  ;;  %v4352_v23 = vcombine.low %v2265_v13, %v5793_v38 }
 0x130   : > { %v6815_v49 = vadd.f32 %v4699_v42, %v4698_v39  ;;  %v4701_v29 = vpop.f32.mrb[18].mxu0  ;;  %v6821_v6 = vadd.f32 %v4811_v56, %v4810_v24  ;;  %v4813_v16 = vpop.f32.mrb[18].mxu1  ;;  %v4350_v39 = vcombine.low %v2263_v59, %v5791_v32  ;;  %v4412_v56 = vcombine.low %v4316_v26, %v6698_v21  ;;  %v5747_v26 = vld [vmem:[%s6044_s9 + $0xd4] ss:$0 sps:$4 sm:$0x33]  }
 0x131   : > { %v4702_v57 = vpop.f32.mrb[19].mxu0  ;;  %v4814_v5 = vpop.f32.mrb[19].mxu1  ;;  %v2728_v21 = vrot.slane %v5739_v44, 2  ;;  %v5749_v32 = vld [vmem:[%s6044_s9 + $0xd4] ss:$0 sps:$4 sm:$0x33]  }
 0x132   : > { %v6827_v1 = vadd.f32 %v4702_v57, %v4701_v29  ;;  %v6831_v3 = vadd.f32 %v4814_v5, %v4813_v16  ;;  %v5741_v29 = vld [vmem:[%s6044_s9 + $0xc8] ss:$0 sps:$4 sm:$0x33]   ;;  %v2739_v54 = vrot.slane %v4350_v39, 2  ;;  %v2740_v57 = vrot.slane %v5737_v33, 2 }
 0x133   : > { %3128 = vmatmul.mubr.bf16.gmra.mrb[124].mxu0 %v2723_v10  ;;  %5191 = vmatmul.mubr.bf16.gmra.mrb[92].mxu1 %v2693_v0  ;;  %v2727_v16 = vrot.slane %v4410_v45, 2  ;;  %v2751_v0 = vrot.slane %v4384_v48, 2  ;;  %v2736_v34 = vrot.slane %v4412_v56, 2  ;;  %v2748_v47 = vrot.slane %v4352_v23, 2 }
 0x134   : > { %3135 = vmatprep.mubr.bf16.mxu0 %v2735_v58  ;;  %5194 = vmatprep.mubr.bf16.mxu1 %v2702_v53  ;;  %v2752_v58 = vrot.slane %v5741_v29, 2  ;;  %v2737_v53 = vrot.slane %v5743_v37, 2  ;;  %v2741_v25 = vsel %vm2621_vm1, %v2739_v54, %v2740_v57  ;;  %v2746_v29 = vrot.slane %v5747_v26, 2  ;;  %v4322_v57 = vld [vmem:[%s6044_s9 + $0xe4] sm:$0xc] }
 0x136   : > { %v4704_v20 = vpop.f32.mrb[20].mxu0  ;;  %v4816_v4 = vpop.f32.mrb[20].mxu1  ;;  %v2753_v33 = vsel %vm2621_vm1, %v2751_v0, %v2752_v58  ;;  %v2738_v44 = vsel %vm2621_vm1, %v2736_v34, %v2737_v53 }
 0x137   : > { %v4705_v35 = vpop.f32.mrb[21].mxu0  ;;  %v4817_v19 = vpop.f32.mrb[21].mxu1 }
 0x138   : > { %v6839_v62 = vadd.f32 %v4705_v35, %v4704_v20  ;;  %v4707_v7 = vpop.f32.mrb[22].mxu0  ;;  %v6845_v42 = vadd.f32 %v4817_v19, %v4816_v4  ;;  %v4819_v24 = vpop.f32.mrb[22].mxu1  ;;  %v2729_v20 = vsel %vm2621_vm1, %v2727_v16, %v2728_v21  ;;  %v5794_v19 = vld [vmem:[%s6044_s9 + $0xd0] sm:$0xf] }
 0x139   : > { %v4708_v40 = vpop.f32.mrb[23].mxu0  ;;  %v4820_v61 = vpop.f32.mrb[23].mxu1 }
 0x13a   : > { %v6851_v10 = vadd.f32 %v4708_v40, %v4707_v7  ;;  %v6855_v12 = vadd.f32 %v4820_v61, %v4819_v24  ;;  %v4414_v7 = vcombine.low %v4318_v18, %v6710_v41  ;;  %v4416_v40 = vcombine.low %v4320_v55, %v6719_v22  ;;  %v5751_v24 = vld [vmem:[%s6044_s9 + $0xe0] ss:$0 sps:$4 sm:$0x33]  }
 0x13b   : > { %3136 = vmatmul.mubr.bf16.gmra.mrb[128].mxu0 %v2732_v27  ;;  %5195 = vmatmul.mubr.bf16.gmra.mrb[0].mxu1 %v2711_v30  ;;  %v4386_v30 = vcombine.low %v4290_v8, %v5794_v19  ;;  %v2749_v41 = vrot.slane %v5745_v2, 2  ;;  %v2761_v61 = vrot.slane %v5749_v32, 2  ;;  %v2755_v22 = vrot.slane %v5751_v24, 2  ;;  %v5753_v2 = vld [vmem:[%s6044_s9 + $0xbc] ss:$0 sps:$4 sm:$0x33]  }
 0x13c   : > { %3143 = vmatprep.mubr.bf16.mxu0 %v2744_v51  ;;  %5198 = vmatprep.mubr.bf16.mxu1 %v2720_v52  ;;  %v2745_v48 = vrot.slane %v4414_v7, 2  ;;  %v2267_v52 = vld [vmem:[%s6044_s9 + $0xb4] sm:$0xc]  ;;  %v2754_v54 = vrot.slane %v4416_v40, 2 }
 0x13d   : > { %v2760_v56 = vrot.slane %v4386_v30, 2  ;;  %v2750_v13 = vsel %vm2621_vm1, %v2748_v47, %v2749_v41 }
 0x13e   : > { %v4710_v5 = vpop.f32.mrb[24].mxu0  ;;  %v4822_v63 = vpop.f32.mrb[24].mxu1  ;;  %v2756_v38 = vsel %vm2621_vm1, %v2754_v54, %v2755_v22 }
 0x13f   : > { %v4711_v50 = vpop.f32.mrb[25].mxu0  ;;  %v4823_v59 = vpop.f32.mrb[25].mxu1  ;;  %v2762_v55 = vsel %vm2621_vm1, %v2760_v56, %v2761_v61 }
 0x140   : > { %v6862_v17 = vadd.f32 %v4711_v50, %v4710_v5  ;;  %v4713_v9 = vpop.f32.mrb[26].mxu0  ;;  %v6868_v4 = vadd.f32 %v4823_v59, %v4822_v63  ;;  %v4825_v27 = vpop.f32.mrb[26].mxu1  ;;  %v5795_v5 = vld [vmem:[%s6044_s9 + $0xb8] sm:$0xf]  ;;  %v2747_v63 = vsel %vm2621_vm1, %v2745_v48, %v2746_v29 }
 0x141   : > { %v4714_v35 = vpop.f32.mrb[27].mxu0  ;;  %v4826_v45 = vpop.f32.mrb[27].mxu1  ;;  %v4354_v53 = vcombine.low %v2267_v52, %v5795_v5  ;;  %v5755_v59 = vld [vmem:[%s6044_s9 + $0xec] ss:$0 sps:$4 sm:$0x33]  }
 0x142   : > { %v6874_v39 = vadd.f32 %v4714_v35, %v4713_v9  ;;  %v6879_v51 = vadd.f32 %v4826_v45, %v4825_v27  ;;  %v4418_v9 = vcombine.low %v4322_v57, %v6737_v14  ;;  %v2758_v35 = vrot.slane %v5753_v2, 2 }
 0x143   : > { %3144 = vmatmul.mubr.bf16.gmra.mrb[132].mxu0 %v2741_v25  ;;  %5199 = vmatmul.mubr.bf16.gmra.mrb[4].mxu1 %v2729_v20  ;;  %v2757_v26 = vrot.slane %v4354_v53, 2 }
 0x144   : > { %3151 = vmatprep.mubr.bf16.mxu0 %v2753_v33  ;;  %5202 = vmatprep.mubr.bf16.mxu1 %v2738_v44  ;;  %v2763_v27 = vrot.slane %v4418_v9, 2  ;;  %v2764_v33 = vrot.slane %v5755_v59, 2 }
 0x145   : > { %v2759_v44 = vsel %vm2621_vm1, %v2757_v26, %v2758_v35 }
 0x146   : > { %v4716_v37 = vpop.f32.mrb[28].mxu0  ;;  %v4828_v21 = vpop.f32.mrb[28].mxu1  ;;  %v2765_v41 = vsel %vm2621_vm1, %v2763_v27, %v2764_v33 }
 0x147   : > { %v4717_v16 = vpop.f32.mrb[29].mxu0  ;;  %v4829_v34 = vpop.f32.mrb[29].mxu1 }
 0x148   : > { %v6883_v0 = vadd.f32 %v4717_v16, %v4716_v37  ;;  %v4719_v58 = vpop.f32.mrb[30].mxu0  ;;  %v6888_v8 = vadd.f32 %v4829_v34, %v4828_v21  ;;  %v4831_v50 = vpop.f32.mrb[30].mxu1 }
 0x149   : > { %v4720_v18 = vpop.f32.mrb[31].mxu0  ;;  %v4832_v20 = vpop.f32.mrb[31].mxu1 }
 0x14a   : > { %v6894_v25 = vadd.f32 %v4720_v18, %v4719_v58  ;;  %v6897_v23 = vadd.f32 %v4832_v20, %v4831_v50 }
 0x14b   : > { %3152 = vmatmul.mubr.bf16.gmra.mrb[136].mxu0 %v2750_v13  ;;  %5203 = vmatmul.mubr.bf16.gmra.mrb[8].mxu1 %v2747_v63 }
 0x14c   : > { %3159 = vmatprep.mubr.bf16.mxu0 %v2762_v55  ;;  %5206 = vmatprep.mubr.bf16.mxu1 %v2756_v38 }
 0x14e   : > { %v4722_v7 = vpop.f32.mrb[32].mxu0  ;;  %v4834_v30 = vpop.f32.mrb[32].mxu1 }
 0x14f   : > { %v4723_v19 = vpop.f32.mrb[33].mxu0  ;;  %v4835_v45 = vpop.f32.mrb[33].mxu1 }
 0x150   : > { %v4724_v14 = vadd.f32 %v4723_v19, %v4722_v7  ;;  %v4725_v32 = vpop.f32.mrb[34].mxu0  ;;  %v6900_v24 = vadd.f32 %v4835_v45, %v4834_v30  ;;  %v4837_v47 = vpop.f32.mrb[34].mxu1 }
 0x151   : > { %v4726_v40 = vpop.f32.mrb[35].mxu0  ;;  %v4838_v29 = vpop.f32.mrb[35].mxu1 }
 0x152   : > { %v4727_v48 = vadd.f32 %v4726_v40, %v4725_v32  ;;  %v6903_v56 = vadd.f32 %v4838_v29, %v4837_v47 }
 0x153   : > { %3160 = vmatmul.mubr.bf16.gmra.mrb[140].mxu0 %v2759_v44  ;;  %5207 = vmatmul.mubr.bf16.gmra.mrb[12].mxu1 %v2765_v41 }
 0x156   : > { %v4728_v61 = vpop.f32.mrb[36].mxu0  ;;  %v4840_v37 = vpop.f32.mrb[36].mxu1 }
 0x157   : > { %v4729_v52 = vpop.f32.mrb[37].mxu0  ;;  %v4841_v57 = vpop.f32.mrb[37].mxu1 }
 0x158   : > { %v4730_v54 = vadd.f32 %v4729_v52, %v4728_v61  ;;  %v4731_v22 = vpop.f32.mrb[38].mxu0  ;;  %v6905_v21 = vadd.f32 %v4841_v57, %v4840_v37  ;;  %v4843_v58 = vpop.f32.mrb[38].mxu1 }
 0x159   : > { %v4732_v16 = vpop.f32.mrb[39].mxu0  ;;  %v4844_v13 = vpop.f32.mrb[39].mxu1 }
 0x15a   : > { %v4733_v34 = vadd.f32 %v4732_v16, %v4731_v22  ;;  %v6907_v5 = vadd.f32 %v4844_v13, %v4843_v58 }
 0x15e   : > { %v4734_v53 = vpop.f32.mrb[40].mxu0  ;;  %v4846_v18 = vpop.f32.mrb[40].mxu1 }
 0x15f   : > { %v4735_v2 = vpop.f32.mrb[41].mxu0  ;;  %v4847_v55 = vpop.f32.mrb[41].mxu1 }
 0x160   : > { %v4736_v50 = vadd.f32 %v4735_v2, %v4734_v53  ;;  %v4737_v63 = vpop.f32.mrb[42].mxu0  ;;  %v6909_v59 = vadd.f32 %v4847_v55, %v4846_v18  ;;  %v4849_v20 = vpop.f32.mrb[42].mxu1 }
 0x161   : > { %v4738_v9 = vpop.f32.mrb[43].mxu0  ;;  %v4850_v26 = vpop.f32.mrb[43].mxu1 }
 0x162   : > { %v4739_v38 = vadd.f32 %v4738_v9, %v4737_v63  ;;  %v6911_v35 = vadd.f32 %v4850_v26, %v4849_v20 }
 0x166   : > { %v4740_v27 = vpop.f32.mrb[44].mxu0  ;;  %v4852_v7 = vpop.f32.mrb[44].mxu1 }
 0x167   : > { %v4741_v33 = vpop.f32.mrb[45].mxu0  ;;  %v4853_v32 = vpop.f32.mrb[45].mxu1 }
 0x168   : > { %v4742_v19 = vadd.f32 %v4741_v33, %v4740_v27  ;;  %v4743_v30 = vpop.f32.mrb[46].mxu0  ;;  %v6913_v44 = vadd.f32 %v4853_v32, %v4852_v7  ;;  %v4855_v40 = vpop.f32.mrb[46].mxu1 }
 0x169   : > { %v4744_v45 = vpop.f32.mrb[47].mxu0  ;;  %v4856_v41 = vpop.f32.mrb[47].mxu1 }
 0x16a   : > { %v4745_v47 = vadd.f32 %v4744_v45, %v4743_v30  ;;  %v6915_v29 = vadd.f32 %v4856_v41, %v4855_v40 }
 0x16e   : > { %v4746_v61 = vpop.f32.mrb[48].mxu0  ;;  %v4858_v52 = vpop.f32.mrb[48].mxu1 }
 0x16f   : > { %v4747_v37 = vpop.f32.mrb[49].mxu0  ;;  %v4859_v57 = vpop.f32.mrb[49].mxu1 }
 0x170   : > { %v6917_v22 = vadd.f32 %v4747_v37, %v4746_v61  ;;  %v4749_v16 = vpop.f32.mrb[50].mxu0  ;;  %v4860_v58 = vadd.f32 %v4859_v57, %v4858_v52  ;;  %v4861_v13 = vpop.f32.mrb[50].mxu1 }
 0x171   : > { %v4750_v53 = vpop.f32.mrb[51].mxu0  ;;  %v4862_v18 = vpop.f32.mrb[51].mxu1 }
 0x172   : > { %v6919_v2 = vadd.f32 %v4750_v53, %v4749_v16  ;;  %v6921_v63 = vadd.f32 %v4860_v58, %v4724_v14  ;;  %v4863_v55 = vadd.f32 %v4862_v18, %v4861_v13 }
 0x174   : > { %v6923_v9 = vadd.f32 %v4863_v55, %v4727_v48 }
 0x176   : > { %v4752_v20 = vpop.f32.mrb[52].mxu0  ;;  %v4864_v26 = vpop.f32.mrb[52].mxu1 }
 0x177   : > { %v4753_v27 = vpop.f32.mrb[53].mxu0  ;;  %v4865_v7 = vpop.f32.mrb[53].mxu1 }
 0x178   : > { %v6925_v33 = vadd.f32 %v4753_v27, %v4752_v20  ;;  %v4755_v30 = vpop.f32.mrb[54].mxu0  ;;  %v4866_v32 = vadd.f32 %v4865_v7, %v4864_v26  ;;  %v4867_v45 = vpop.f32.mrb[54].mxu1 }
 0x179   : > { %v4756_v40 = vpop.f32.mrb[55].mxu0  ;;  %v4868_v61 = vpop.f32.mrb[55].mxu1 }
 0x17a   : > { %v6927_v41 = vadd.f32 %v4756_v40, %v4755_v30  ;;  %v6929_v52 = vadd.f32 %v4866_v32, %v4730_v54  ;;  %v4869_v14 = vadd.f32 %v4868_v61, %v4867_v45 }
 0x17c   : > { %v6931_v37 = vadd.f32 %v4869_v14, %v4733_v34 }
 0x17e   : > { %v4758_v48 = vpop.f32.mrb[56].mxu0  ;;  %v4870_v57 = vpop.f32.mrb[56].mxu1 }
 0x17f   : > { %v4759_v16 = vpop.f32.mrb[57].mxu0  ;;  %v4871_v13 = vpop.f32.mrb[57].mxu1 }
 0x180   : > { %v6933_v58 = vadd.f32 %v4759_v16, %v4758_v48  ;;  %v4761_v53 = vpop.f32.mrb[58].mxu0  ;;  %v4872_v18 = vadd.f32 %v4871_v13, %v4870_v57  ;;  %v4873_v55 = vpop.f32.mrb[58].mxu1 }
 0x181   : > { %v4762_v20 = vpop.f32.mrb[59].mxu0  ;;  %v4874_v27 = vpop.f32.mrb[59].mxu1 }
 0x182   : > { %v6935_v26 = vadd.f32 %v4762_v20, %v4761_v53  ;;  %v6937_v7 = vadd.f32 %v4872_v18, %v4736_v50  ;;  %v4875_v54 = vadd.f32 %v4874_v27, %v4873_v55 }
 0x184   : > { %v6939_v30 = vadd.f32 %v4875_v54, %v4739_v38 }
 0x186   : > { %7241 = vst [vmem:[#allocation6_spill] sm:$0xff] %v6939_v30  ;;  %v4764_v34 = vpop.f32.mrb[60].mxu0  ;;  %v4876_v32 = vpop.f32.mrb[60].mxu1 }
 0x187   : > { %v4765_v45 = vpop.f32.mrb[61].mxu0  ;;  %v4877_v61 = vpop.f32.mrb[61].mxu1 }
 0x188   : > { %v6941_v40 = vadd.f32 %v4765_v45, %v4764_v34  ;;  %v4767_v14 = vpop.f32.mrb[62].mxu0  ;;  %v4878_v48 = vadd.f32 %v4877_v61, %v4876_v32  ;;  %v4879_v16 = vpop.f32.mrb[62].mxu1 }
 0x189   : > { %v4768_v57 = vpop.f32.mrb[63].mxu0  ;;  %v4880_v53 = vpop.f32.mrb[63].mxu1 }
 0x18a   : > { %v6943_v13 = vadd.f32 %v4768_v57, %v4767_v14  ;;  %v6945_v20 = vadd.f32 %v4878_v48, %v4742_v19  ;;  %v4881_v50 = vadd.f32 %v4880_v53, %v4879_v16 }
 0x18c   : > { %v6947_v18 = vadd.f32 %v4881_v50, %v4745_v47 }
 0x18e   : > { %v5084_v38 = vpop.f32.mrb[64].mxu0  ;;  %v4882_v27 = vpop.f32.mrb[64].mxu1 }
 0x18f   : > { %v1653_v55 = vadd.f32 %v5084_v38, %v6746_v31  ;;  %v1644_v54 = vpop.f32.mrb[65].mxu0  ;;  %v4883_v45 = vpop.f32.mrb[65].mxu1 }
 0x190   : > { %v1645_v34 = vadd.f32 %v6714_v46, %v1644_v54  ;;  %v5085_v30 = vpop.f32.mrb[66].mxu0  ;;  %v4884_v61 = vadd.f32 %v4883_v45, %v4882_v27  ;;  %v4885_v19 = vpop.f32.mrb[66].mxu1 }
 0x191   : > { %v6952_v32 = vadd.f32 %v6845_v42, %v1653_v55  ;;  %v1656_v14 = vadd.f32 %v5085_v30, %v6751_v36  ;;  %v1647_v48 = vpop.f32.mrb[67].mxu0  ;;  %v4886_v31 = vpop.f32.mrb[67].mxu1 }
 0x192   : > { %v6956_v47 = vadd.f32 %v6821_v6, %v1645_v34  ;;  %v1648_v16 = vadd.f32 %v6725_v43, %v1647_v48  ;;  %v6960_v57 = vadd.f32 %v4884_v61, %v6917_v22  ;;  %v4887_v53 = vadd.f32 %v4886_v31, %v4885_v19 }
 0x193   : > { %v6963_v46 = vadd.f32 %v6855_v12, %v1656_v14 }
 0x194   : > { %v6966_v42 = vadd.f32 %v6831_v3, %v1648_v16  ;;  %v6969_v36 = vadd.f32 %v4887_v53, %v6919_v2 }
 0x196   : > { %v5088_v30 = vpop.f32.mrb[68].mxu0  ;;  %v4888_v50 = vpop.f32.mrb[68].mxu1 }
 0x197   : > { %v1669_v6 = vadd.f32 %v5088_v30, %v6792_v60  ;;  %v1660_v38 = vpop.f32.mrb[69].mxu0  ;;  %v4889_v55 = vpop.f32.mrb[69].mxu1 }
 0x198   : > { %v1661_v43 = vadd.f32 %v6769_v15, %v1660_v38  ;;  %v5089_v22 = vpop.f32.mrb[70].mxu0  ;;  %v4890_v12 = vadd.f32 %v4889_v55, %v4888_v50  ;;  %v4891_v3 = vpop.f32.mrb[70].mxu1 }
 0x199   : > { %v6974_v27 = vadd.f32 %v6888_v8, %v1669_v6  ;;  %v1672_v54 = vadd.f32 %v5089_v22, %v6800_v11  ;;  %v1663_v34 = vpop.f32.mrb[71].mxu0  ;;  %v4892_v60 = vpop.f32.mrb[71].mxu1 }
 0x19a   : > { %v6978_v2 = vadd.f32 %v6868_v4, %v1661_v43  ;;  %v1664_v45 = vadd.f32 %v6774_v28, %v1663_v34  ;;  %v6982_v61 = vadd.f32 %v4890_v12, %v6925_v33  ;;  %v4893_v14 = vadd.f32 %v4892_v60, %v4891_v3 }
 0x19b   : > { %v6985_v15 = vadd.f32 %v6897_v23, %v1672_v54 }
 0x19c   : > { %v6988_v8 = vadd.f32 %v6879_v51, %v1664_v45  ;;  %v6991_v11 = vadd.f32 %v4893_v14, %v6927_v41 }
 0x19e   : > { %v5092_v19 = vpop.f32.mrb[72].mxu0  ;;  %v4894_v48 = vpop.f32.mrb[72].mxu1 }
 0x19f   : > { %v1685_v4 = vadd.f32 %v5092_v19, %v6839_v62  ;;  %v1676_v16 = vpop.f32.mrb[73].mxu0  ;;  %v4895_v31 = vpop.f32.mrb[73].mxu1 }
 0x1a0   : > { %v1677_v28 = vadd.f32 %v6815_v49, %v1676_v16  ;;  %v5093_v33 = vpop.f32.mrb[74].mxu0  ;;  %v4896_v23 = vadd.f32 %v4895_v31, %v4894_v48  ;;  %v4897_v51 = vpop.f32.mrb[74].mxu1 }
 0x1a1   : > { %v6996_v53 = vadd.f32 %v6905_v21, %v1685_v4  ;;  %v1688_v30 = vadd.f32 %v5093_v33, %v6851_v10  ;;  %v1679_v6 = vpop.f32.mrb[75].mxu0  ;;  %v4898_v62 = vpop.f32.mrb[75].mxu1 }
 0x1a2   : > { %v7000_v41 = vadd.f32 %v6900_v24, %v1677_v28  ;;  %v1680_v50 = vadd.f32 %v6827_v1, %v1679_v6  ;;  %v7004_v38 = vadd.f32 %v4896_v23, %v6933_v58  ;;  %v4899_v43 = vadd.f32 %v4898_v62, %v4897_v51 }
 0x1a3   : > { %v7007_v49 = vadd.f32 %v6907_v5, %v1688_v30 }
 0x1a4   : > { %v1985_v21 = vadd.f32 %v6903_v56, %v1680_v50  ;;  %v7011_v55 = vadd.f32 %v4899_v43, %v6935_v26 }
 0x1a6   : > { %v5096_v10 = vpop.f32.mrb[76].mxu0  ;;  %v4900_v24 = vpop.f32.mrb[76].mxu1 }
 0x1a7   : > { %v1701_v22 = vadd.f32 %v5096_v10, %v6883_v0  ;;  %v1692_v12 = vpop.f32.mrb[77].mxu0  ;;  %v4901_v54 = vpop.f32.mrb[77].mxu1 }
 0x1a8   : > { %v1693_v1 = vadd.f32 %v6862_v17, %v1692_v12  ;;  %v5097_v3 = vpop.f32.mrb[78].mxu0  ;;  %v4902_v5 = vadd.f32 %v4901_v54, %v4900_v24  ;;  %v4903_v45 = vpop.f32.mrb[78].mxu1 }
 0x1a9   : > { %v7016_v58 = vadd.f32 %v6913_v44, %v1701_v22  ;;  %v1704_v34 = vadd.f32 %v5097_v3, %v6894_v25  ;;  %v1695_v56 = vpop.f32.mrb[79].mxu0  ;;  %v4904_v14 = vpop.f32.mrb[79].mxu1 }
 0x1aa   : > { %v1998_v26 = vadd.f32 %v6909_v59, %v1693_v1  ;;  %v1696_v60 = vadd.f32 %v6874_v39, %v1695_v56  ;;  %v7022_v0 = vadd.f32 %v4902_v5, %v6941_v40  ;;  %v4905_v19 = vadd.f32 %v4904_v14, %v4903_v45 }
 0x1ab   : > { %v7025_v17 = vadd.f32 %v6915_v29, %v1704_v34 }
 0x1ac   : > { %v2001_v44 = vadd.f32 %v6911_v35, %v1696_v60  ;;  %v7029_v4 = vadd.f32 %v4905_v19, %v6943_v13 }
 0x1ae   : > { %v4946_v25 = vpop.f32.mrb[80].mxu0 }
 0x1af   : > { %v4947_v48 = vpop.f32.mrb[81].mxu0 }
 0x1b0   : > { %v4948_v16 = vadd.f32 %v4947_v48, %v4946_v25  ;;  %v4949_v28 = vpop.f32.mrb[82].mxu0 }
 0x1b1   : > { %v4950_v59 = vpop.f32.mrb[83].mxu0 }
 0x1b2   : > { %v4951_v31 = vadd.f32 %v4950_v59, %v4949_v28  ;;  %v7032_v39 = vadd.f32 %v4948_v16, %v6956_v47 }
 0x1b4   : > { %v7035_v40 = vadd.f32 %v4951_v31, %v6966_v42 }
 0x1b6   : > { %v4952_v29 = vpop.f32.mrb[84].mxu0 }
 0x1b7   : > { %v4953_v33 = vpop.f32.mrb[85].mxu0 }
 0x1b8   : > { %v4954_v23 = vadd.f32 %v4953_v33, %v4952_v29  ;;  %v4955_v30 = vpop.f32.mrb[86].mxu0 }
 0x1b9   : > { %v4956_v35 = vpop.f32.mrb[87].mxu0 }
 0x1ba   : > { %v4957_v51 = vadd.f32 %v4956_v35, %v4955_v30  ;;  %v5228_v13 = vadd.f32 %v4954_v23, %v6952_v32 }
 0x1bc   : > { %v5236_v6 = vadd.f32 %v4957_v51, %v6963_v46 }
 0x1be   : > { %v4958_v50 = vpop.f32.mrb[88].mxu0 }
 0x1bf   : > { %v4959_v62 = vpop.f32.mrb[89].mxu0 }
 0x1c0   : > { %v4960_v43 = vadd.f32 %v4959_v62, %v4958_v50  ;;  %v4961_v10 = vpop.f32.mrb[90].mxu0 }
 0x1c1   : > { %v4962_v22 = vpop.f32.mrb[91].mxu0 }
 0x1c2   : > { %v4963_v47 = vadd.f32 %v4962_v22, %v4961_v10  ;;  %v7040_v24 = vadd.f32 %v4960_v43, %v6978_v2 }
 0x1c4   : > { %v7043_v42 = vadd.f32 %v4963_v47, %v6988_v8 }
 0x1c6   : > { %v4964_v12 = vpop.f32.mrb[92].mxu0 }
 0x1c7   : > { %v4965_v1 = vpop.f32.mrb[93].mxu0 }
 0x1c8   : > { %v4966_v54 = vadd.f32 %v4965_v1, %v4964_v12  ;;  %v4967_v3 = vpop.f32.mrb[94].mxu0 }
 0x1c9   : > { %v4968_v5 = vpop.f32.mrb[95].mxu0 }
 0x1ca   : > { %v4969_v32 = vadd.f32 %v4968_v5, %v4967_v3  ;;  %v7046_v46 = vadd.f32 %v4966_v54, %v6974_v27 }
 0x1cc   : > { %v7049_v34 = vadd.f32 %v4969_v32, %v6985_v15 }
 0x1ce   : > { %v4970_v45 = vpop.f32.mrb[96].mxu0 }
 0x1cf   : > { %v4971_v56 = vpop.f32.mrb[97].mxu0 }
 0x1d0   : > { %v4972_v60 = vadd.f32 %v4971_v56, %v4970_v45  ;;  %v4973_v2 = vpop.f32.mrb[98].mxu0 }
 0x1d1   : > { %v4974_v14 = vpop.f32.mrb[99].mxu0 }
 0x1d2   : > { %v4975_v19 = vadd.f32 %v4974_v14, %v4973_v2  ;;  %v7052_v8 = vadd.f32 %v4972_v60, %v7000_v41 }
 0x1d4   : > { %v7054_v25 = vadd.f32 %v4975_v19, %v1985_v21 }
 0x1d6   : > { %v4976_v48 = vpop.f32.mrb[100].mxu0 }
 0x1d7   : > { %v4977_v16 = vpop.f32.mrb[101].mxu0 }
 0x1d8   : > { %v4978_v28 = vadd.f32 %v4977_v16, %v4976_v48  ;;  %v4979_v59 = vpop.f32.mrb[102].mxu0 }
 0x1d9   : > { %v4980_v27 = vpop.f32.mrb[103].mxu0 }
 0x1da   : > { %v4981_v31 = vadd.f32 %v4980_v27, %v4979_v59  ;;  %v7057_v15 = vadd.f32 %v4978_v28, %v6996_v53 }
 0x1dc   : > { %v7060_v29 = vadd.f32 %v4981_v31, %v7007_v49 }
 0x1de   : > { %v4982_v33 = vpop.f32.mrb[104].mxu0 }
 0x1df   : > { %v4983_v23 = vpop.f32.mrb[105].mxu0 }
 0x1e0   : > { %v4984_v30 = vadd.f32 %v4983_v23, %v4982_v33  ;;  %v4985_v35 = vpop.f32.mrb[106].mxu0 }
 0x1e1   : > { %v4986_v41 = vpop.f32.mrb[107].mxu0 }
 0x1e2   : > { %v4987_v51 = vadd.f32 %v4986_v41, %v4985_v35  ;;  %v7062_v21 = vadd.f32 %v4984_v30, %v1998_v26  ;;  %v7075_v26 = vld [vmem:[%s7237_s2] ss:$0 sm:$0xff] }
 0x1e4   : > { %v7064_v50 = vadd.f32 %v4987_v51, %v2001_v44 }
 0x1e6   : > { %v4988_v62 = vpop.f32.mrb[108].mxu0 }
 0x1e7   : > { %v4989_v43 = vpop.f32.mrb[109].mxu0 }
 0x1e8   : > { %v4990_v10 = vadd.f32 %v4989_v43, %v4988_v62  ;;  %v4991_v22 = vpop.f32.mrb[110].mxu0 }
 0x1e9   : > { %v4992_v53 = vpop.f32.mrb[111].mxu0 }
 0x1ea   : > { %v4993_v47 = vadd.f32 %v4992_v53, %v4991_v22  ;;  %v7067_v49 = vadd.f32 %v4990_v10, %v7016_v58 }
 0x1ec   : > { %v7070_v12 = vadd.f32 %v4993_v47, %v7025_v17 }
 0x1ee   : > { %v4994_v1 = vpop.f32.mrb[112].mxu0  ;;  %v5180_v54 = vpop.f32.mrb[80].mxu1 }
 0x1ef   : > { %v4995_v44 = vpop.f32.mrb[113].mxu0  ;;  %v5229_v3 = vadd.f32 %v5228_v13, %v5180_v54  ;;  %v3202_v32 = vpop.f32.mrb[81].mxu1 }
 0x1f0   : > { %v4996_v5 = vadd.f32 %v4995_v44, %v4994_v1  ;;  %v4997_v45 = vpop.f32.mrb[114].mxu0  ;;  %v5233_v56 = vadd.f32 %v7032_v39, %v3202_v32  ;;  %v5181_v58 = vpop.f32.mrb[82].mxu1 }
 0x1f1   : > { %v4998_v60 = vpop.f32.mrb[115].mxu0  ;;  %v3541_v17 = vadd.f32 %v5229_v3, %v7075_v26  ;;  %v5237_v2 = vadd.f32 %v5236_v6, %v5181_v58  ;;  %v3205_v19 = vpop.f32.mrb[83].mxu1 }
 0x1f2   : > { %v4999_v14 = vadd.f32 %v4998_v60, %v4997_v45  ;;  %v7081_v48 = vadd.f32 %v6921_v63, %v4996_v5  ;;  %v3539_v16 = vadd.f32 %v5233_v56, %v7075_v26  ;;  %v5241_v13 = vadd.f32 %v7035_v40, %v3205_v19 }
 0x1f3   : > { %v3542_v28 = vadd.f32 %v5237_v2, %v7075_v26  ;;  %v3573_v27 = vmax.f32 %v3541_v17, 0.0 }
 0x1f4   : > { %v7089_v39 = vadd.f32 %v6923_v9, %v4999_v14  ;;  %v3540_v59 = vadd.f32 %v5241_v13, %v7075_v26  ;;  %v3571_v33 = vmax.f32 %v3539_v16, 0.0 }
 0x1f5   : > { %v3574_v6 = vmax.f32 %v3542_v28, 0.0 }
 0x1f6   : > { %v5000_v31 = vpop.f32.mrb[116].mxu0  ;;  %v3572_v23 = vmax.f32 %v3540_v59, 0.0  ;;  %v5184_v63 = vpop.f32.mrb[84].mxu1 }
 0x1f7   : > { %v5001_v30 = vpop.f32.mrb[117].mxu0  ;;  %v4571_v35 = vpack.c.bf16 %v3574_v6, %v3573_v27  ;;  %v5245_v41 = vadd.f32 %v7046_v46, %v5184_v63  ;;  %v3218_v51 = vpop.f32.mrb[85].mxu1 }
 0x1f8   : > { %v5002_v40 = vadd.f32 %v5001_v30, %v5000_v31  ;;  %v5003_v62 = vpop.f32.mrb[118].mxu0  ;;  %v4566_v43 = vpack.c.bf16 %v3572_v23, %v3571_v33  ;;  %v5249_v10 = vadd.f32 %v7040_v24, %v3218_v51  ;;  %v5185_v9 = vpop.f32.mrb[86].mxu1 }
 0x1f9   : > { %v5004_v22 = vpop.f32.mrb[119].mxu0  ;;  %4643 = vst [vmem:[%s7094_s4 + $0x8] sm:$0xff] %v4571_v35   ;;  %v3545_v53 = vadd.f32 %v5245_v41, %v7075_v26  ;;  %v5253_v47 = vadd.f32 %v7049_v34, %v5185_v9  ;;  %v3221_v54 = vpop.f32.mrb[87].mxu1 }
 0x1fa   : > { %v5005_v1 = vadd.f32 %v5004_v22, %v5003_v62  ;;  %v7100_v46 = vadd.f32 %v6929_v52, %v5002_v40  ;;  %4567 = vst [vmem:[%s7094_s4] sm:$0xff] %v4566_v43   ;;  %v3543_v44 = vadd.f32 %v5249_v10, %v7075_v26  ;;  %v5257_v24 = vadd.f32 %v7043_v42, %v3221_v54 }
 0x1fb   : > { %v3546_v3 = vadd.f32 %v5253_v47, %v7075_v26  ;;  %v3577_v45 = vmax.f32 %v3545_v53, 0.0 }
 0x1fc   : > { %v7107_v5 = vadd.f32 %v6931_v37, %v5005_v1  ;;  %v3544_v32 = vadd.f32 %v5257_v24, %v7075_v26  ;;  %v3575_v58 = vmax.f32 %v3543_v44, 0.0 }
 0x1fd   : > { %v3578_v34 = vmax.f32 %v3546_v3, 0.0 }
 0x1fe   : > { %v5006_v56 = vpop.f32.mrb[120].mxu0  ;;  %v3576_v60 = vmax.f32 %v3544_v32, 0.0  ;;  %v5188_v52 = vpop.f32.mrb[88].mxu1 }
 0x1ff   : > { %v5007_v17 = vpop.f32.mrb[121].mxu0  ;;  %v4581_v2 = vpack.c.bf16 %v3578_v34, %v3577_v45  ;;  %v5261_v14 = vadd.f32 %v7057_v15, %v5188_v52  ;;  %v3234_v19 = vpop.f32.mrb[89].mxu1 }
 0x200   : > { %v5008_v42 = vadd.f32 %v5007_v17, %v5006_v56  ;;  %v5009_v16 = vpop.f32.mrb[122].mxu0  ;;  %v4576_v13 = vpack.c.bf16 %v3576_v60, %v3575_v58  ;;  %v5265_v37 = vadd.f32 %v7052_v8, %v3234_v19  ;;  %v5189_v28 = vpop.f32.mrb[90].mxu1  ;;  %v7242_v8 = vld [vmem:[#allocation6_spill] sm:$0xff] }
 0x201   : > { %v5010_v59 = vpop.f32.mrb[123].mxu0  ;;  %4645 = vst [vmem:[%s7094_s4 + $0x18] sm:$0xff] %v4581_v2   ;;  %v3549_v27 = vadd.f32 %v5261_v14, %v7075_v26  ;;  %v5269_v6 = vadd.f32 %v7060_v29, %v5189_v28  ;;  %v3237_v33 = vpop.f32.mrb[91].mxu1 }
 0x202   : > { %v5011_v31 = vadd.f32 %v5010_v59, %v5009_v16  ;;  %v7116_v23 = vadd.f32 %v6937_v7, %v5008_v42  ;;  %4644 = vst [vmem:[%s7094_s4 + $0x10] sm:$0xff] %v4576_v13   ;;  %v3547_v15 = vadd.f32 %v5265_v37, %v7075_v26  ;;  %v5273_v63 = vadd.f32 %v7054_v25, %v3237_v33 }
 0x203   : > { %v3550_v30 = vadd.f32 %v5269_v6, %v7075_v26  ;;  %v3581_v40 = vmax.f32 %v3549_v27, 0.0 }
 0x204   : > { %v7123_v35 = vadd.f32 %v7242_v8, %v5011_v31  ;;  %v3548_v41 = vadd.f32 %v5273_v63, %v7075_v26  ;;  %v3579_v62 = vmax.f32 %v3547_v15, 0.0 }
 0x205   : > { %v3582_v29 = vmax.f32 %v3550_v30, 0.0 }
 0x206   : > { %v5012_v51 = vpop.f32.mrb[124].mxu0  ;;  %v3580_v43 = vmax.f32 %v3548_v41, 0.0  ;;  %v5192_v7 = vpop.f32.mrb[92].mxu1 }
 0x207   : > { %v5013_v10 = vpop.f32.mrb[125].mxu0  ;;  %v4591_v9 = vpack.c.bf16 %v3582_v29, %v3581_v40  ;;  %v5277_v22 = vadd.f32 %v7067_v49, %v5192_v7  ;;  %v3250_v53 = vpop.f32.mrb[93].mxu1 }
 0x208   : > { %v5014_v25 = vadd.f32 %v5013_v10, %v5012_v51  ;;  %v5015_v47 = vpop.f32.mrb[126].mxu0  ;;  %v4586_v1 = vpack.c.bf16 %v3580_v43, %v3579_v62  ;;  %v5281_v54 = vadd.f32 %v7062_v21, %v3250_v53  ;;  %v5193_v44 = vpop.f32.mrb[94].mxu1 }
 0x209   : > { %v5016_v24 = vpop.f32.mrb[127].mxu0  ;;  %4647 = vst [vmem:[%s7094_s4 + $0x28] sm:$0xff] %v4591_v9   ;;  %v3553_v3 = vadd.f32 %v5277_v22, %v7075_v26  ;;  %v5285_v32 = vadd.f32 %v7070_v12, %v5193_v44  ;;  %v3253_v34 = vpop.f32.mrb[95].mxu1 }
 0x20a   : > { %v5017_v45 = vadd.f32 %v5016_v24, %v5015_v47  ;;  %v5303_v56 = vadd.f32 %v6945_v20, %v5014_v25  ;;  %4646 = vst [vmem:[%s7094_s4 + $0x20] sm:$0xff] %v4586_v1   ;;  %v3551_v49 = vadd.f32 %v5281_v54, %v7075_v26  ;;  %v5289_v58 = vadd.f32 %v7064_v50, %v3253_v34 }
 0x20b   : > { %v3554_v60 = vadd.f32 %v5285_v32, %v7075_v26  ;;  %v3585_v17 = vmax.f32 %v3553_v3, 0.0 }
 0x20c   : > { %v5309_v21 = vadd.f32 %v6947_v18, %v5017_v45  ;;  %v3552_v52 = vadd.f32 %v5289_v58, %v7075_v26  ;;  %v3583_v12 = vmax.f32 %v3551_v49, 0.0 }
 0x20d   : > { %v3586_v2 = vmax.f32 %v3554_v60, 0.0 }
 0x20e   : > { %v5018_v14 = vpop.f32.mrb[128].mxu0  ;;  %v3584_v42 = vmax.f32 %v3552_v52, 0.0  ;;  %v5196_v19 = vpop.f32.mrb[0].mxu1 }
 0x20f   : > { %v5019_v16 = vpop.f32.mrb[129].mxu0  ;;  %v4601_v20 = vpack.c.bf16 %v3586_v2, %v3585_v17  ;;  %v5292_v13 = vadd.f32 %v7100_v46, %v5196_v19  ;;  %v3266_v50 = vpop.f32.mrb[1].mxu1 }
 0x210   : > { %v5020_v37 = vadd.f32 %v5019_v16, %v5018_v14  ;;  %v5021_v28 = vpop.f32.mrb[130].mxu0  ;;  %v4596_v59 = vpack.c.bf16 %v3584_v42, %v3583_v12  ;;  %v5295_v18 = vadd.f32 %v7081_v48, %v3266_v50  ;;  %v5197_v27 = vpop.f32.mrb[2].mxu1 }
 0x211   : > { %v5022_v6 = vpop.f32.mrb[131].mxu0  ;;  %4649 = vst [vmem:[%s7094_s4 + $0x38] sm:$0xff] %v4601_v20   ;;  %v3557_v31 = vadd.f32 %v5292_v13, %v7075_v26  ;;  %v5298_v33 = vadd.f32 %v7107_v5, %v5197_v27  ;;  %v3269_v63 = vpop.f32.mrb[3].mxu1 }
 0x212   : > { %v5023_v15 = vadd.f32 %v5022_v6, %v5021_v28  ;;  %v5318_v30 = vadd.f32 %v6960_v57, %v5020_v37  ;;  %4648 = vst [vmem:[%s7094_s4 + $0x30] sm:$0xff] %v4596_v59   ;;  %v3555_v46 = vadd.f32 %v5295_v18, %v7075_v26  ;;  %v5301_v8 = vadd.f32 %v7089_v39, %v3269_v63 }
 0x213   : > { %v3558_v41 = vadd.f32 %v5298_v33, %v7075_v26  ;;  %v3589_v29 = vmax.f32 %v3557_v31, 0.0 }
 0x214   : > { %v5324_v48 = vadd.f32 %v6969_v36, %v5023_v15  ;;  %v3556_v40 = vadd.f32 %v5301_v8, %v7075_v26  ;;  %v3587_v5 = vmax.f32 %v3555_v46, 0.0 }
 0x215   : > { %v3590_v51 = vmax.f32 %v3558_v41, 0.0 }
 0x216   : > { %v5024_v62 = vpop.f32.mrb[132].mxu0  ;;  %v3588_v43 = vmax.f32 %v3556_v40, 0.0  ;;  %v5200_v7 = vpop.f32.mrb[4].mxu1 }
 0x217   : > { %v5025_v10 = vpop.f32.mrb[133].mxu0  ;;  %v4611_v57 = vpack.c.bf16 %v3590_v51, %v3589_v29  ;;  %v5304_v9 = vadd.f32 %v5303_v56, %v5200_v7  ;;  %v3282_v25 = vpop.f32.mrb[5].mxu1 }
 0x218   : > { %v5026_v22 = vadd.f32 %v5025_v10, %v5024_v62  ;;  %v5027_v39 = vpop.f32.mrb[134].mxu0  ;;  %v4606_v53 = vpack.c.bf16 %v3588_v43, %v3587_v5  ;;  %v5307_v47 = vadd.f32 %v7116_v23, %v3282_v25  ;;  %v5201_v36 = vpop.f32.mrb[6].mxu1 }
 0x219   : > { %v5028_v1 = vpop.f32.mrb[135].mxu0  ;;  %4651 = vst [vmem:[%s7094_s4 + $0x48] sm:$0xff] %v4611_v57   ;;  %v3561_v54 = vadd.f32 %v5304_v9, %v7075_v26  ;;  %v5310_v44 = vadd.f32 %v5309_v21, %v5201_v36  ;;  %v3285_v3 = vpop.f32.mrb[7].mxu1 }
 0x21a   : > { %v5029_v24 = vadd.f32 %v5028_v1, %v5027_v39  ;;  %v5315_v32 = vadd.f32 %v6982_v61, %v5026_v22  ;;  %4650 = vst [vmem:[%s7094_s4 + $0x40] sm:$0xff] %v4606_v53   ;;  %v3559_v45 = vadd.f32 %v5307_v47, %v7075_v26  ;;  %v5313_v34 = vadd.f32 %v7123_v35, %v3285_v3 }
 0x21b   : > { %v3562_v56 = vadd.f32 %v5310_v44, %v7075_v26  ;;  %v3593_v58 = vmax.f32 %v3561_v54, 0.0 }
 0x21c   : > { %v5321_v49 = vadd.f32 %v6991_v11, %v5029_v24  ;;  %v3560_v23 = vadd.f32 %v5313_v34, %v7075_v26  ;;  %v3591_v21 = vmax.f32 %v3559_v45, 0.0 }
 0x21d   : > { %v3594_v60 = vmax.f32 %v3562_v56, 0.0 }
 0x21e   : > { %v5030_v52 = vpop.f32.mrb[136].mxu0  ;;  %v3592_v17 = vmax.f32 %v3560_v23, 0.0  ;;  %v5204_v2 = vpop.f32.mrb[8].mxu1 }
 0x21f   : > { %v5031_v14 = vpop.f32.mrb[137].mxu0  ;;  %v4621_v61 = vpack.c.bf16 %v3594_v60, %v3593_v58  ;;  %v5316_v12 = vadd.f32 %v5315_v32, %v5204_v2  ;;  %v3298_v19 = vpop.f32.mrb[9].mxu1 }
 0x220   : > { %v5032_v42 = vadd.f32 %v5031_v14, %v5030_v52  ;;  %v5033_v35 = vpop.f32.mrb[138].mxu0  ;;  %v4616_v16 = vpack.c.bf16 %v3592_v17, %v3591_v21  ;;  %v5319_v20 = vadd.f32 %v5318_v30, %v3298_v19  ;;  %v5205_v13 = vpop.f32.mrb[10].mxu1 }
 0x221   : > { %v5034_v11 = vpop.f32.mrb[139].mxu0  ;;  %4653 = vst [vmem:[%s7094_s4 + $0x58] sm:$0xff] %v4621_v61   ;;  %v3565_v37 = vadd.f32 %v5316_v12, %v7075_v26  ;;  %v5322_v50 = vadd.f32 %v5321_v49, %v5205_v13  ;;  %v3301_v59 = vpop.f32.mrb[11].mxu1 }
 0x222   : > { %v5035_v28 = vadd.f32 %v5034_v11, %v5033_v35  ;;  %v5330_v18 = vadd.f32 %v7004_v38, %v5032_v42  ;;  %4652 = vst [vmem:[%s7094_s4 + $0x50] sm:$0xff] %v4616_v16   ;;  %v3563_v27 = vadd.f32 %v5319_v20, %v7075_v26  ;;  %v5325_v6 = vadd.f32 %v5324_v48, %v3301_v59 }
 0x223   : > { %v3566_v31 = vadd.f32 %v5322_v50, %v7075_v26  ;;  %v3597_v63 = vmax.f32 %v3565_v37, 0.0 }
 0x224   : > { %v5336_v33 = vadd.f32 %v7011_v55, %v5035_v28  ;;  %v3564_v15 = vadd.f32 %v5325_v6, %v7075_v26  ;;  %v3595_v8 = vmax.f32 %v3563_v27, 0.0 }
 0x225   : > { %v3598_v30 = vmax.f32 %v3566_v31, 0.0 }
 0x226   : > { %v5036_v46 = vpop.f32.mrb[140].mxu0  ;;  %v3596_v41 = vmax.f32 %v3564_v15, 0.0  ;;  %v5208_v40 = vpop.f32.mrb[12].mxu1 }
 0x227   : > { %v5037_v29 = vpop.f32.mrb[141].mxu0  ;;  %v4631_v38 = vpack.c.bf16 %v3598_v30, %v3597_v63  ;;  %v3314_v62 = vpop.f32.mrb[13].mxu1 }
 0x228   : > { %v5038_v51 = vadd.f32 %v5037_v29, %v5036_v46  ;;  %v5039_v5 = vpop.f32.mrb[142].mxu0  ;;  %v4626_v48 = vpack.c.bf16 %v3596_v41, %v3595_v8  ;;  %v5331_v43 = vadd.f32 %v5330_v18, %v3314_v62  ;;  %v5209_v7 = vpop.f32.mrb[14].mxu1 }
 0x229   : > { %v5040_v10 = vpop.f32.mrb[143].mxu0  ;;  %4655 = vst [vmem:[%s7094_s4 + $0x68] sm:$0xff] %v4631_v38   ;;  %v3317_v9 = vpop.f32.mrb[15].mxu1 }
 0x22a   : > { %v5327_v55 = vadd.f32 %v7022_v0, %v5038_v51  ;;  %v5041_v57 = vadd.f32 %v5040_v10, %v5039_v5  ;;  %4654 = vst [vmem:[%s7094_s4 + $0x60] sm:$0xff] %v4626_v48   ;;  %v3567_v22 = vadd.f32 %v5331_v43, %v7075_v26  ;;  %v5337_v25 = vadd.f32 %v5336_v33, %v3317_v9 }
 0x22c   : > { %v5328_v39 = vadd.f32 %v5327_v55, %v5208_v40  ;;  %v5333_v53 = vadd.f32 %v7029_v4, %v5041_v57  ;;  %v3568_v47 = vadd.f32 %v5337_v25, %v7075_v26  ;;  %v3599_v54 = vmax.f32 %v3567_v22, 0.0 }
 0x22e   : > { %v3569_v36 = vadd.f32 %v5328_v39, %v7075_v26  ;;  %v5334_v1 = vadd.f32 %v5333_v53, %v5209_v7  ;;  %v3600_v0 = vmax.f32 %v3568_v47, 0.0 }
 0x230   : > { %v3570_v44 = vadd.f32 %v5334_v1, %v7075_v26  ;;  %v4636_v24 = vpack.c.bf16 %v3600_v0, %v3599_v54  ;;  %v3601_v3 = vmax.f32 %v3569_v36, 0.0 }
 0x232   : > { %v3602_v32 = vmax.f32 %v3570_v44, 0.0  ;;  %4656 = vst [vmem:[%s7094_s4 + $0x70] sm:$0xff] %v4636_v24  }
 0x234   : > { %v4641_v4 = vpack.c.bf16 %v3602_v32, %v3601_v3 }
 0x236   : > { %4657 = vst [vmem:[%s7094_s4 + $0x78] sm:$0xff] %v4641_v4  }
 0x237   : > { %5809 = shalt.err (!%p5806_p5)
}
 0x238   : > { %s5810_s23 = scalar_lea.hbm %s7182_s10, 2048  ;;  %s5814_s9 = scalar_lea.hbm %s7238_s3, 4096 }
 0x239   : > { %p5811_p6 = scmp.ne.s32.totalorder %s7182_s10, %s5810_s23  ;;  %p5815_p10 = scmp.lt.u32.totalorder %s7182_s10, %s7238_s3 }
 0x23a   : > { %p5816_p11 = scmp.lt.u32.totalorder %s5814_s9, %s5810_s23  ;;  %p5818_p13 = scmp.lt.u32.totalorder %s5810_s23, %s7182_s10 }
 0x23b   : > { %p5812_p7 = pnand %p5811_p6, %p5939_p4 }
 0x23c   : > { %p5817_p12 = por %p5816_p11, %p5815_p10 }
 0x23d   : > { %p5813_p9 = pneg %p5812_p7 }
 0x23e   : > { %p5819_p0 = por %p5818_p13, %p5817_p12 }
 0x240   : > { %p5820_p1 = pnand %p5819_p0, %p5813_p9 }
 0x242   : > { %5823 = shalt.err (!%p5820_p1)
}
 0x243   : > { %s5877_s30 = smov 64   ;;  %s5878_s4 = smov 4  }
 0x244   : > { %5387 = dma.vmem_to_hbm [thread:$0]  (%p5939_p4), %s7184_s6, 2048, %s7182_s10, %s7189_s11, %s5877_s30, %s5877_s30, %s5878_s4  }
 0x245 PF: > { %p5393_p2 = scmp.ge.s32.totalorder %s5874_s17, 2  ;;  %s3793_s5 = sand.u32 1, %s5854_s12  }
 0x246   : > { %s3794_s7 = scalar_lea.sflag [#allocation4], %s3793_s5 }
 0x247   : > { %p5390_p3 = pnand %p5393_p2, %p5946_p8 }
 0x249   : > { %5849 = dma.done.wait (!%p5390_p3), %s3794_s7, 2048  }
 0x24a   : > { %5851 = vsyncadd (!%p5390_p3), %s3794_s7, 4294965248  ;;  %s16_s17 = sadd.s32 1, %s5874_s17   ;;  %s7243_s12 = smov %s5858_s13 }
 0x24b   : > { %p13_p5 = scmp.ge.s32.totalorder %s16_s17, 4   ;;  %s7244_s13 = smov %s5862_s14 }
 0x24c   : > { %s7245_s14 = smov %s5952_s25  ;;  %s7246_s15 = smov %s5870_s16 }
 0x24d   : > { %s7247_s16 = smov %s7249_s20  ;;  %15 = sbr.rel (!%p13_p5) target bundleno = 4 (0x4), region = 89 }
 0x254   :  { %3799 = vsyncpa [#allocation4], 1 }
 0x255   :  { %3801 = vsyncpa [#allocation4 + $0x1], 1 }

</bundles_post_ra>
